<compile_context>
chip_gen: v6e
topology: v6e:2x2x1
jax: 0.10.0
libtpu: 0.0.40
codegen_flags: <defaults>
</compile_context>

<pallas_src>
import math

import jax
import jax.numpy as jnp
from jax.experimental import pallas as pl
from jax.experimental.pallas import tpu as pltpu

IN_DIM = 2048
HID_DIM = 512
OUT_DIM = 256


def _round_up(x, m):
    return ((x + m - 1) // m) * m


def _mlp_kernel(x_ref, w1_ref, b1_ref, w2_ref, b2_ref, o_ref):
    # Layer 1: x @ w1 (bf16 inputs, f32 MXU accumulate), + b1 (f32), ReLU.
    h = jnp.dot(x_ref[...], w1_ref[...], preferred_element_type=jnp.float32)
    h = jnp.maximum(h + b1_ref[...], 0.0)            # (TM, 512) + (1, 512)

    # Layer 2: cast hidden to bf16 for the MXU, f32 accumulate, + b2, ReLU.
    y = jnp.dot(h.astype(jnp.bfloat16), w2_ref[...],
                preferred_element_type=jnp.float32)
    y = jnp.maximum(y + b2_ref[...], 0.0)            # (TM, 256) + (1, 256)

    o_ref[...] = y.astype(o_ref.dtype)


def mlp_forward(x, w1, b1, w2, b2, *, tm=256):
    """x: [B, 2048] f32; weights stored [in, out]; returns [B, 256] f32.

    Batch is tiled over the grid (weights stay VMEM-resident via constant
    index maps); matmul operands are bf16 with f32 accumulation.
    """
    B = x.shape[0]
    out_dtype = x.dtype

    # Pick a batch tile: multiple of 8 sublanes, at most `tm` rows.
    TM = min(tm, _round_up(B, 8))
    B_pad = _round_up(B, TM)
    if B_pad != B:
        x = jnp.pad(x, ((0, B_pad - B), (0, 0)))

    # bf16 matmul operands; f32 biases as 2-D lane-dense tiles.
    x_b = x.astype(jnp.bfloat16)
    w1_b = w1.astype(jnp.bfloat16)
    w2_b = w2.astype(jnp.bfloat16)
    b1_2d = b1.reshape(1, HID_DIM).astype(jnp.float32)
    b2_2d = b2.reshape(1, OUT_DIM).astype(jnp.float32)

    grid = (B_pad // TM,)

    out = pl.pallas_call(
        _mlp_kernel,
        out_shape=jax.ShapeDtypeStruct((B_pad, OUT_DIM), out_dtype),
        grid_spec=pltpu.PrefetchScalarGridSpec(
            num_scalar_prefetch=0,
            grid=grid,
            in_specs=[
                # x tile: marches with the batch grid index (double-buffered).
                pl.BlockSpec((TM, IN_DIM), lambda i: (i, 0)),
                # Weights / biases: constant block index -> resident in VMEM.
                pl.BlockSpec((IN_DIM, HID_DIM), lambda i: (0, 0)),
                pl.BlockSpec((1, HID_DIM), lambda i: (0, 0)),
                pl.BlockSpec((HID_DIM, OUT_DIM), lambda i: (0, 0)),
                pl.BlockSpec((1, OUT_DIM), lambda i: (0, 0)),
            ],
            out_specs=pl.BlockSpec((TM, OUT_DIM), lambda i: (i, 0)),
        ),
        compiler_params=pltpu.CompilerParams(
            # Batch tiles are independent -> megacore-shardable on v7x.
            dimension_semantics=("parallel",),
            # bf16 weights (~2.25 MiB) + double-buffered tiles fit easily;
            # keep headroom for v7x's 64 MiB physical VMEM.
            vmem_limit_bytes=32 << 20,
        ),
    )(x_b, w1_b, b1_2d, w2_b, b2_2d)

    return out[:B]


def init_params(key):
    """Match PyTorch nn.Linear default init: U(-1/sqrt(fan_in), 1/sqrt(fan_in))."""
    k1, k2, k3, k4 = jax.random.split(key, 4)
    bound1 = 1.0 / math.sqrt(IN_DIM)
    bound2 = 1.0 / math.sqrt(HID_DIM)
    # Stored as [in, out] (transposed from PyTorch's [out, in]).
    w1 = jax.random.uniform(k1, (IN_DIM, HID_DIM), jnp.float32, -bound1, bound1)
    b1 = jax.random.uniform(k2, (HID_DIM,), jnp.float32, -bound1, bound1)
    w2 = jax.random.uniform(k3, (HID_DIM, OUT_DIM), jnp.float32, -bound2, bound2)
    b2 = jax.random.uniform(k4, (OUT_DIM,), jnp.float32, -bound2, bound2)
    return w1, b1, w2, b2


def _reference(x, w1, b1, w2, b2):
    # Mirror the kernel's bf16 operand casts with f32 accumulation.
    xb = x.astype(jnp.bfloat16).astype(jnp.float32)
    w1b = w1.astype(jnp.bfloat16).astype(jnp.float32)
    w2b = w2.astype(jnp.bfloat16).astype(jnp.float32)
    h = jnp.maximum(xb @ w1b + b1, 0.0)
    hb = h.astype(jnp.bfloat16).astype(jnp.float32)
    return jnp.maximum(hb @ w2b + b2, 0.0)


if __name__ == "__main__":
    key = jax.random.PRNGKey(0)
    k_x, k_p = jax.random.split(key)

    B = 8
    x = jax.random.normal(k_x, (B, IN_DIM), jnp.float32)
    w1, b1, w2, b2 = init_params(k_p)

    out = mlp_forward(x, w1, b1, w2, b2)
    out = jax.block_until_ready(out)

    ref = _reference(x, w1, b1, w2, b2)
    assert out.shape == (B, OUT_DIM)
    assert jnp.allclose(out, ref, atol=2e-2, rtol=2e-2), float(
        jnp.max(jnp.abs(out - ref)))

    print("KERNEL_OK")
</pallas_src>

<mosaic_0001>
module attributes {stable_mosaic.version = 11 : i64} {
  func.func @_mlp_kernel(%arg0: i32, %arg1: memref<8x2048xbf16, #tpu.memory_space<vmem>>, %arg2: memref<2048x512xbf16, #tpu.memory_space<vmem>>, %arg3: memref<1x512xf32, #tpu.memory_space<vmem>>, %arg4: memref<512x256xbf16, #tpu.memory_space<vmem>>, %arg5: memref<1x256xf32, #tpu.memory_space<vmem>>, %arg6: memref<8x256xf32, #tpu.memory_space<vmem>>) attributes {dimension_semantics = [#tpu.dimension_semantics<parallel>], iteration_bounds = array<i64: 1>, scalar_prefetch = 0 : i64, scratch_operands = 0 : i64, tpu.core_type = #tpu.core_type<tc>, window_params = [{transform_indices = @transform_0, window_bounds = array<i64: 8, 2048>}, {pipeline_mode = #tpu.pipeline_mode<synchronous>, transform_indices = @transform_1, window_bounds = array<i64: 2048, 512>}, {pipeline_mode = #tpu.pipeline_mode<synchronous>, transform_indices = @transform_2, window_bounds = array<i64: 1, 512>}, {pipeline_mode = #tpu.pipeline_mode<synchronous>, transform_indices = @transform_3, window_bounds = array<i64: 512, 256>}, {pipeline_mode = #tpu.pipeline_mode<synchronous>, transform_indices = @transform_4, window_bounds = array<i64: 1, 256>}, {transform_indices = @transform_5, window_bounds = array<i64: 8, 256>}]} {
    %c0 = arith.constant 0 : index
    %c0_0 = arith.constant 0 : index
    %0 = vector.load %arg1[%c0, %c0_0] : memref<8x2048xbf16, #tpu.memory_space<vmem>>, vector<8x2048xbf16>
    %c0_1 = arith.constant 0 : index
    %c0_2 = arith.constant 0 : index
    %1 = vector.load %arg2[%c0_1, %c0_2] : memref<2048x512xbf16, #tpu.memory_space<vmem>>, vector<2048x512xbf16>
    %cst = arith.constant dense<0.000000e+00> : vector<8x512xf32>
    %2 = tpu.matmul %0, %1, %cst {dimension_numbers = #tpu.dot_dimension_numbers<[1], [0], [0], [1], [0, 0, 1, 1], [], []>} : vector<8x2048xbf16>, vector<2048x512xbf16>, vector<8x512xf32> -> vector<8x512xf32>
    %c0_3 = arith.constant 0 : index
    %c0_4 = arith.constant 0 : index
    %3 = vector.load %arg3[%c0_3, %c0_4] : memref<1x512xf32, #tpu.memory_space<vmem>>, vector<1x512xf32>
    %4 = vector.broadcast %3 : vector<1x512xf32> to vector<8x512xf32>
    %5 = arith.addf %2, %4 : vector<8x512xf32>
    %cst_5 = arith.constant 0.000000e+00 : f32
    %6 = vector.broadcast %cst_5 : f32 to vector<8x512xf32>
    %7 = arith.maximumf %5, %6 : vector<8x512xf32>
    %8 = arith.truncf %7 : vector<8x512xf32> to vector<8x512xbf16>
    %c0_6 = arith.constant 0 : index
    %c0_7 = arith.constant 0 : index
    %9 = vector.load %arg4[%c0_6, %c0_7] : memref<512x256xbf16, #tpu.memory_space<vmem>>, vector<512x256xbf16>
    %cst_8 = arith.constant dense<0.000000e+00> : vector<8x256xf32>
    %10 = tpu.matmul %8, %9, %cst_8 {dimension_numbers = #tpu.dot_dimension_numbers<[1], [0], [0], [1], [0, 0, 1, 1], [], []>} : vector<8x512xbf16>, vector<512x256xbf16>, vector<8x256xf32> -> vector<8x256xf32>
    %c0_9 = arith.constant 0 : index
    %c0_10 = arith.constant 0 : index
    %11 = vector.load %arg5[%c0_9, %c0_10] : memref<1x256xf32, #tpu.memory_space<vmem>>, vector<1x256xf32>
    %12 = vector.broadcast %11 : vector<1x256xf32> to vector<8x256xf32>
    %13 = arith.addf %10, %12 : vector<8x256xf32>
    %cst_11 = arith.constant 0.000000e+00 : f32
    %14 = vector.broadcast %cst_11 : f32 to vector<8x256xf32>
    %15 = arith.maximumf %13, %14 : vector<8x256xf32>
    %c0_12 = arith.constant 0 : index
    %c0_13 = arith.constant 0 : index
    %16 = vector.load %arg6[%c0_12, %c0_13] : memref<8x256xf32, #tpu.memory_space<vmem>>, vector<8x256xf32>
    tpu.vector_store %arg6[%c0_12, %c0_13], %15 {strides = array<i32>} : memref<8x256xf32, #tpu.memory_space<vmem>>, vector<8x256xf32>,
    return
  }
  func.func @transform_0(%arg0: i32) -> (i32, i32) {
    %c0_i32 = arith.constant 0 : i32
    %c0_i32_0 = arith.constant 0 : i32
    return %arg0, %c0_i32 : i32, i32
  }
  func.func @transform_1(%arg0: i32) -> (i32, i32) {
    %c0_i32 = arith.constant 0 : i32
    %c0_i32_0 = arith.constant 0 : i32
    %c0_i32_1 = arith.constant 0 : i32
    return %c0_i32, %c0_i32_0 : i32, i32
  }
  func.func @transform_2(%arg0: i32) -> (i32, i32) {
    %c0_i32 = arith.constant 0 : i32
    %c0_i32_0 = arith.constant 0 : i32
    %c0_i32_1 = arith.constant 0 : i32
    return %c0_i32, %c0_i32_0 : i32, i32
  }
  func.func @transform_3(%arg0: i32) -> (i32, i32) {
    %c0_i32 = arith.constant 0 : i32
    %c0_i32_0 = arith.constant 0 : i32
    %c0_i32_1 = arith.constant 0 : i32
    return %c0_i32, %c0_i32_0 : i32, i32
  }
  func.func @transform_4(%arg0: i32) -> (i32, i32) {
    %c0_i32 = arith.constant 0 : i32
    %c0_i32_0 = arith.constant 0 : i32
    %c0_i32_1 = arith.constant 0 : i32
    return %c0_i32, %c0_i32_0 : i32, i32
  }
  func.func @transform_5(%arg0: i32) -> (i32, i32) {
    %c0_i32 = arith.constant 0 : i32
    %c0_i32_0 = arith.constant 0 : i32
    return %arg0, %c0_i32 : i32, i32
  }
}

</mosaic_0001>

<bundles_post_ra>
// kernel: tpu_custom_call.1
= control target key start
LH: loop header
LB: loop body
LE: loop exit
PB: predicated region body
PF: predicated region fallthrough
CT: control target
= control target key end

     0   :  { %10 = vsyncpa [#allocation3], 0  ;;  %s6220_s0 = inlined_call_operand.hbm [shape: bf16[8,2048], index: 0, kind: input, shape index: {}]   ;;  %s6221_s1 = inlined_call_operand.hbm [shape: bf16[2048,512], index: 1, kind: input, shape index: {}]   ;;  %s6222_s2 = inlined_call_operand.hbm [shape: f32[1,512], index: 2, kind: input, shape index: {}]   ;;  %s6223_s3 = inlined_call_operand.hbm [shape: bf16[512,256], index: 3, kind: input, shape index: {}]   ;;  %s6224_s4 = inlined_call_operand.hbm [shape: f32[1,256], index: 4, kind: input, shape index: {}]   ;;  %s6225_s5 = inlined_call_operand.hbm [shape: f32[8,256], index: 5, kind: output, shape index: {}]  }
   0x1   :  { %11 = vsyncpa [#allocation6], 0 }
   0x2   :  { %12 = vsyncpa [#allocation9], 0 }
   0x3   :  { %13 = vsyncpa [#allocation4], 0  ;;  %s6015_s18 = smov [#allocation5]  }
   0x4   :  { %s29_s19 = sshll.u32 %s6015_s18, 4  ;;  %s30_s19 = int_to_ptr.vmem [resolvable:$true] %s29_s19 }
   0x5   :  { %s5895_s20 = scalar_lea.vmem %s30_s19, 65536  ;;  %p5900_p1 = scmp.lt.s32.totalorder %s30_s19, %s30_s19 }
   0x6   :  { %p5896_p0 = scmp.ne.s32.totalorder %s30_s19, %s5895_s20  ;;  %p5901_p2 = scmp.lt.s32.totalorder %s5895_s20, %s5895_s20 }
   0x8   :  { %p5902_p3 = por %p5901_p2, %p5900_p1 }
   0xa   :  { %p5903_p4 = pnand %p5902_p3, %p5896_p0 }
   0xc   :  { %5906 = shalt.err (!%p5903_p4)
}
   0xd   :  { %s6016_s21 = smov 256   ;;  %s6017_s22 = smov 16  }
   0xe   :  { %35 = dma.hbm_to_vmem [thread:$0]  %s6221_s1, 65536, %s30_s19, [#allocation6], %s6016_s21, %s6016_s21, %s6017_s22  }
   0xf   :  { %s6018_s25 = smov [#allocation8]  }
  0x10   :  { %s51_s26 = sshll.u32 %s6018_s25, 4  ;;  %s52_s26 = int_to_ptr.vmem [resolvable:$true] %s51_s26 }
  0x11   :  { %s5915_s27 = scalar_lea.vmem %s52_s26, 8192  ;;  %p5920_p6 = scmp.lt.s32.totalorder %s52_s26, %s52_s26 }
  0x12   :  { %p5916_p5 = scmp.ne.s32.totalorder %s52_s26, %s5915_s27  ;;  %p5921_p7 = scmp.lt.s32.totalorder %s5915_s27, %s5915_s27 }
  0x14   :  { %p5922_p8 = por %p5921_p7, %p5920_p6 }
  0x16   :  { %p5923_p9 = pnand %p5922_p8, %p5916_p5 }
  0x18   :  { %5926 = shalt.err (!%p5923_p9)
}
  0x19   :  { %s6019_s28 = smov 128   ;;  %s6020_s29 = smov 8  }
  0x1a   :  { %57 = dma.hbm_to_vmem [thread:$0]  %s6223_s3, 8192, %s52_s26, [#allocation9], %s6019_s28, %s6019_s28, %s6020_s29  }
  0x1b   :  { %s6021_s7 = smov [#allocation2]   ;;  %s6022_s9 = smov [#allocation7]  }
  0x1c   :  { %s20_s8 = sshll.u32 %s6021_s7, 4  ;;  %s42_s1 = sshll.u32 %s6022_s9, 4  ;;  %s21_s8 = int_to_ptr.vmem [resolvable:$true] %s20_s8  ;;  %s43_s1 = int_to_ptr.vmem [resolvable:$true] %s42_s1 }
  0x1d   :  { %s5935_s10 = scalar_lea.vmem %s21_s8, 1024  ;;  %p5940_p11 = scmp.lt.s32.totalorder %s21_s8, %s21_s8 }
  0x1e   :  { %p5936_p10 = scmp.ne.s32.totalorder %s21_s8, %s5935_s10  ;;  %p5941_p12 = scmp.lt.s32.totalorder %s5935_s10, %s5935_s10 }
  0x20   :  { %p5942_p13 = por %p5941_p12, %p5940_p11 }
  0x22   :  { %p5943_p0 = pnand %p5942_p13, %p5936_p10 }
  0x24   :  { %5946 = shalt.err (!%p5943_p0)
}
  0x25   :  { %23 = dma.hbm_to_vmem [thread:$0]  %s6220_s0, 1024, %s21_s8, [#allocation3]  }
  0x26   :  { %s5955_s13 = scalar_lea.vmem %s43_s1, 64  ;;  %p5960_p2 = scmp.lt.s32.totalorder %s43_s1, %s43_s1 }
  0x27   :  { %p5956_p1 = scmp.ne.s32.totalorder %s43_s1, %s5955_s13  ;;  %p5961_p3 = scmp.lt.s32.totalorder %s5955_s13, %s5955_s13 }
  0x29   :  { %p5962_p4 = por %p5961_p3, %p5960_p2 }
  0x2b   :  { %p5963_p5 = pnand %p5962_p4, %p5956_p1 }
  0x2d   :  { %5966 = shalt.err (!%p5963_p5)
}
  0x2e   :  { %45 = dma.hbm_to_vmem [thread:$0]  %s6222_s2, 64, %s43_s1, [#allocation6]  }
  0x2f   :  { %s6023_s15 = smov [#allocation10]  }
  0x30   :  { %s64_s16 = sshll.u32 %s6023_s15, 4  ;;  %s65_s16 = int_to_ptr.vmem [resolvable:$true] %s64_s16 }
  0x31   :  { %s5975_s17 = scalar_lea.vmem %s65_s16, 32  ;;  %p5980_p7 = scmp.lt.s32.totalorder %s65_s16, %s65_s16 }
  0x32   :  { %p5976_p6 = scmp.ne.s32.totalorder %s65_s16, %s5975_s17  ;;  %p5981_p8 = scmp.lt.s32.totalorder %s5975_s17, %s5975_s17 }
  0x34   :  { %p5982_p9 = por %p5981_p8, %p5980_p7 }
  0x36   :  { %p5983_p10 = pnand %p5982_p9, %p5976_p6 }
  0x38   :  { %5986 = shalt.err (!%p5983_p10)
}
  0x39   :  { %67 = dma.hbm_to_vmem [thread:$0]  %s6224_s4, 32, %s65_s16, [#allocation9]  }
  0x3a   :  { %6007 = dma.done.wait [#allocation3], 1024  }
  0x3b   :  { %6008 = vsyncadd [#allocation3], 4294966272 }
  0x3c   :  { %6009 = dma.done.wait [#allocation6], 65600  }
  0x3d   :  { %6010 = vsyncadd [#allocation6], 4294901696 }
  0x3e   :  { %6011 = dma.done.wait [#allocation9], 8224  }
  0x3f   :  { %6012 = vsyncadd [#allocation9], 4294959072  ;;  %v5006_v0 = vld [vmem:[#allocation5 + $0xe4] ss:$16 sps:$4 sm:$0xff]   ;;  %v5010_v2 = vld [vmem:[#allocation5 + $0xe0] ss:$16 sps:$4 sm:$0xff]  }
  0x40   :  { %v5008_v1 = vld [vmem:[#allocation5 + $0x2e4] ss:$16 sps:$4 sm:$0xff]   ;;  %3241 = vmatprep.subr.bf16.mxu0 %v5006_v0  ;;  %v5011_v3 = vld [vmem:[#allocation5 + $0x2e0] ss:$16 sps:$4 sm:$0xff]   ;;  %v84_v48 = vld [vmem:[#allocation2 + $0x8] sm:$0xff]  ;;  %s6024_s2 = smov [#allocation11]  }
  0x41   :  { %3282 = vmatprep.subr.bf16.mxu1 %v5008_v1  ;;  %v5012_v4 = vld [vmem:[#allocation5 + $0xc4] ss:$16 sps:$4 sm:$0xff]   ;;  %3242 = vmatpush1.bf16.msra.mxu0 %v5010_v2  ;;  %v5016_v6 = vld [vmem:[#allocation5 + $0xc0] ss:$16 sps:$4 sm:$0xff]   ;;  %v6072_v51 = vcombine.high %v84_v48, %v84_v48  ;;  %s4393_s4 = sshll.u32 %s6024_s2, 4  ;;  %s4394_s4 = int_to_ptr.vmem [resolvable:$true] %s4393_s4 }
  0x42   :  { %3283 = vmatpush1.bf16.msra.mxu1 %v5011_v3  ;;  %v5014_v5 = vld [vmem:[#allocation5 + $0x2c4] ss:$16 sps:$4 sm:$0xff]   ;;  %3243 = vmatprep.subr.bf16.mxu0 %v5012_v4  ;;  %v5017_v7 = vld [vmem:[#allocation5 + $0x2c0] ss:$16 sps:$4 sm:$0xff]   ;;  %s5987_s19 = scalar_lea.vmem %s4394_s4, 256  ;;  %p5992_p12 = scmp.lt.s32.totalorder %s4394_s4, %s4394_s4 }
  0x43   :  { %3284 = vmatprep.subr.bf16.mxu1 %v5014_v5  ;;  %v5018_v8 = vld [vmem:[#allocation5 + $0xa4] ss:$16 sps:$4 sm:$0xff]   ;;  %v5022_v10 = vld [vmem:[#allocation5 + $0xa0] ss:$16 sps:$4 sm:$0xff]   ;;  %3314 = vmatprep.mubr.bf16.mxu1 %v6072_v51  ;;  %p5988_p11 = scmp.ne.s32.totalorder %s4394_s4, %s5987_s19  ;;  %p5993_p13 = scmp.lt.s32.totalorder %s5987_s19, %s5987_s19 }
  0x44   :  { %v5020_v9 = vld [vmem:[#allocation5 + $0x2a4] ss:$16 sps:$4 sm:$0xff]   ;;  %v5023_v11 = vld [vmem:[#allocation5 + $0x2a0] ss:$16 sps:$4 sm:$0xff]  }
  0x45   :  { %3244 = vmatpush1.bf16.msra.mxu0 %v5016_v6  ;;  %v5024_v12 = vld [vmem:[#allocation5 + $0x84] ss:$16 sps:$4 sm:$0xff]   ;;  %v5028_v14 = vld [vmem:[#allocation5 + $0x80] ss:$16 sps:$4 sm:$0xff]   ;;  %p5994_p0 = por %p5993_p13, %p5992_p12 }
  0x46   :  { %3285 = vmatpush1.bf16.msra.mxu1 %v5017_v7  ;;  %3245 = vmatprep.subr.bf16.mxu0 %v5018_v8  ;;  %v5026_v13 = vld [vmem:[#allocation5 + $0x284] ss:$16 sps:$4 sm:$0xff]   ;;  %v5029_v15 = vld [vmem:[#allocation5 + $0x280] ss:$16 sps:$4 sm:$0xff]   ;;  %v6078_v7 = vcombine.low %v84_v48, %v84_v48 }
  0x47   :  { %3286 = vmatprep.subr.bf16.mxu1 %v5020_v9  ;;  %v5030_v16 = vld [vmem:[#allocation5 + $0x64] ss:$16 sps:$4 sm:$0xff]   ;;  %v5034_v18 = vld [vmem:[#allocation5 + $0x60] ss:$16 sps:$4 sm:$0xff]   ;;  %p5995_p1 = pnand %p5994_p0, %p5988_p11 }
  0x48   :  { %v5032_v17 = vld [vmem:[#allocation5 + $0x264] ss:$16 sps:$4 sm:$0xff]   ;;  %v5035_v19 = vld [vmem:[#allocation5 + $0x260] ss:$16 sps:$4 sm:$0xff]  }
  0x49   :  { %3246 = vmatpush1.bf16.msra.mxu0 %v5022_v10  ;;  %v5036_v20 = vld [vmem:[#allocation5 + $0x44] ss:$16 sps:$4 sm:$0xff]   ;;  %v5040_v22 = vld [vmem:[#allocation5 + $0x40] ss:$16 sps:$4 sm:$0xff]  }
  0x4a   :  { %3287 = vmatpush1.bf16.msra.mxu1 %v5023_v11  ;;  %3247 = vmatprep.subr.bf16.mxu0 %v5024_v12  ;;  %v5038_v21 = vld [vmem:[#allocation5 + $0x244] ss:$16 sps:$4 sm:$0xff]   ;;  %v5041_v23 = vld [vmem:[#allocation5 + $0x240] ss:$16 sps:$4 sm:$0xff]  }
  0x4b   :  { %3288 = vmatprep.subr.bf16.mxu1 %v5026_v13  ;;  %v5042_v24 = vld [vmem:[#allocation5 + $0x24] ss:$16 sps:$4 sm:$0xff]   ;;  %v5046_v26 = vld [vmem:[#allocation5 + $0x20] ss:$16 sps:$4 sm:$0xff]  }
  0x4c   :  { %v5044_v25 = vld [vmem:[#allocation5 + $0x224] ss:$16 sps:$4 sm:$0xff]   ;;  %v5047_v27 = vld [vmem:[#allocation5 + $0x220] ss:$16 sps:$4 sm:$0xff]  }
  0x4d   :  { %3248 = vmatpush1.bf16.msra.mxu0 %v5028_v14  ;;  %v5048_v28 = vld [vmem:[#allocation5 + $0x4] ss:$16 sps:$4 sm:$0xff]   ;;  %v5052_v30 = vld [vmem:[#allocation5] ss:$16 sps:$4 sm:$0xff]  }
  0x4e   :  { %3289 = vmatpush1.bf16.msra.mxu1 %v5029_v15  ;;  %3249 = vmatprep.subr.bf16.mxu0 %v5030_v16  ;;  %v5050_v29 = vld [vmem:[#allocation5 + $0x204] ss:$16 sps:$4 sm:$0xff]   ;;  %v5053_v31 = vld [vmem:[#allocation5 + $0x200] ss:$16 sps:$4 sm:$0xff]  }
  0x4f   :  { %3290 = vmatprep.subr.bf16.mxu1 %v5032_v17  ;;  %v5054_v32 = vld [vmem:[#allocation5 + $0x1e4] ss:$16 sps:$4 sm:$0xff]   ;;  %v5058_v34 = vld [vmem:[#allocation5 + $0x1e0] ss:$16 sps:$4 sm:$0xff]  }
  0x50   :  { %v5056_v33 = vld [vmem:[#allocation5 + $0x3e4] ss:$16 sps:$4 sm:$0xff]   ;;  %v5059_v35 = vld [vmem:[#allocation5 + $0x3e0] ss:$16 sps:$4 sm:$0xff]  }
  0x51   :  { %3250 = vmatpush1.bf16.msra.mxu0 %v5034_v18  ;;  %v5060_v36 = vld [vmem:[#allocation5 + $0x1c4] ss:$16 sps:$4 sm:$0xff]   ;;  %v5064_v38 = vld [vmem:[#allocation5 + $0x1c0] ss:$16 sps:$4 sm:$0xff]  }
  0x52   :  { %3291 = vmatpush1.bf16.msra.mxu1 %v5035_v19  ;;  %3251 = vmatprep.subr.bf16.mxu0 %v5036_v20  ;;  %v5062_v37 = vld [vmem:[#allocation5 + $0x3c4] ss:$16 sps:$4 sm:$0xff]   ;;  %v5065_v39 = vld [vmem:[#allocation5 + $0x3c0] ss:$16 sps:$4 sm:$0xff]  }
  0x53   :  { %3292 = vmatprep.subr.bf16.mxu1 %v5038_v21  ;;  %v5066_v40 = vld [vmem:[#allocation5 + $0x1a4] ss:$16 sps:$4 sm:$0xff]   ;;  %v5070_v42 = vld [vmem:[#allocation5 + $0x1a0] ss:$16 sps:$4 sm:$0xff]  }
  0x54   :  { %v5068_v41 = vld [vmem:[#allocation5 + $0x3a4] ss:$16 sps:$4 sm:$0xff]   ;;  %v5071_v43 = vld [vmem:[#allocation5 + $0x3a0] ss:$16 sps:$4 sm:$0xff]  }
  0x55   :  { %3252 = vmatpush1.bf16.msra.mxu0 %v5040_v22  ;;  %v5072_v44 = vld [vmem:[#allocation5 + $0x184] ss:$16 sps:$4 sm:$0xff]   ;;  %v5076_v49 = vld [vmem:[#allocation5 + $0x180] ss:$16 sps:$4 sm:$0xff]  }
  0x56   :  { %3293 = vmatpush1.bf16.msra.mxu1 %v5041_v23  ;;  %3253 = vmatprep.subr.bf16.mxu0 %v5042_v24  ;;  %v5074_v45 = vld [vmem:[#allocation5 + $0x384] ss:$16 sps:$4 sm:$0xff]   ;;  %v5077_v50 = vld [vmem:[#allocation5 + $0x380] ss:$16 sps:$4 sm:$0xff]  }
  0x57   :  { %3294 = vmatprep.subr.bf16.mxu1 %v5044_v25  ;;  %v83_v46 = vld [vmem:[#allocation2] sm:$0xff] }
  0x58   :  { %v6070_v47 = vcombine.high %v83_v46, %v83_v46  ;;  %v5078_v52 = vld [vmem:[#allocation5 + $0x164] ss:$16 sps:$4 sm:$0xff]   ;;  %v5082_v54 = vld [vmem:[#allocation5 + $0x160] ss:$16 sps:$4 sm:$0xff]   ;;  %v6076_v6 = vcombine.low %v83_v46, %v83_v46 }
  0x59   :  { %3254 = vmatpush1.bf16.msra.mxu0 %v5046_v26  ;;  %v5080_v53 = vld [vmem:[#allocation5 + $0x364] ss:$16 sps:$4 sm:$0xff]   ;;  %v5083_v55 = vld [vmem:[#allocation5 + $0x360] ss:$16 sps:$4 sm:$0xff]  }
  0x5a   :  { %3295 = vmatpush1.bf16.msra.mxu1 %v5047_v27  ;;  %3255 = vmatprep.subr.bf16.mxu0 %v5048_v28  ;;  %v5084_v56 = vld [vmem:[#allocation5 + $0x144] ss:$16 sps:$4 sm:$0xff]   ;;  %v5088_v58 = vld [vmem:[#allocation5 + $0x140] ss:$16 sps:$4 sm:$0xff]  }
  0x5b   :  { %3296 = vmatprep.subr.bf16.mxu1 %v5050_v29  ;;  %3273 = vmatprep.mubr.bf16.mxu0 %v6070_v47  ;;  %v5086_v57 = vld [vmem:[#allocation5 + $0x344] ss:$16 sps:$4 sm:$0xff]   ;;  %v5089_v59 = vld [vmem:[#allocation5 + $0x340] ss:$16 sps:$4 sm:$0xff]  }
  0x5c   :  { %v5090_v60 = vld [vmem:[#allocation5 + $0x124] ss:$16 sps:$4 sm:$0xff]   ;;  %v5094_v62 = vld [vmem:[#allocation5 + $0x120] ss:$16 sps:$4 sm:$0xff]  }
  0x5d   :  { %3256 = vmatpush1.bf16.msra.mxu0 %v5052_v30  ;;  %v5092_v61 = vld [vmem:[#allocation5 + $0x324] ss:$16 sps:$4 sm:$0xff]   ;;  %v5095_v63 = vld [vmem:[#allocation5 + $0x320] ss:$16 sps:$4 sm:$0xff]  }
  0x5e   :  { %3297 = vmatpush1.bf16.msra.mxu1 %v5053_v31  ;;  %3257 = vmatprep.subr.bf16.mxu0 %v5054_v32  ;;  %v5096_v0 = vld [vmem:[#allocation5 + $0x104] ss:$16 sps:$4 sm:$0xff]   ;;  %v5100_v2 = vld [vmem:[#allocation5 + $0x100] ss:$16 sps:$4 sm:$0xff]  }
  0x5f   :  { %3298 = vmatprep.subr.bf16.mxu1 %v5056_v33  ;;  %v5098_v1 = vld [vmem:[#allocation5 + $0x304] ss:$16 sps:$4 sm:$0xff]   ;;  %v5101_v3 = vld [vmem:[#allocation5 + $0x300] ss:$16 sps:$4 sm:$0xff]   ;;  %v6084_v33 = vld [vmem:[#allocation2 + $0x18] sm:$0xff] }
  0x60   :  { %v5108_v4 = vld [vmem:[#allocation5 + $0x4e4] ss:$16 sps:$4 sm:$0xff]   ;;  %v5106_v8 = vld [vmem:[#allocation5 + $0x4e0] ss:$16 sps:$4 sm:$0xff]  }
  0x61   :  { %3258 = vmatpush2.bf16.msra.mxu0 %v5058_v34  ;;  %v5111_v5 = vld [vmem:[#allocation5 + $0x6e4] ss:$16 sps:$4 sm:$0xff]   ;;  %v5109_v9 = vld [vmem:[#allocation5 + $0x6e0] ss:$16 sps:$4 sm:$0xff]  }
  0x62   :  { %3299 = vmatpush2.bf16.msra.mxu1 %v5059_v35  ;;  %3259 = vmatprep.subr.bf16.mxu0 %v5060_v36  ;;  %v5114_v10 = vld [vmem:[#allocation5 + $0x4c4] ss:$16 sps:$4 sm:$0xff]   ;;  %v5112_v12 = vld [vmem:[#allocation5 + $0x4c0] ss:$16 sps:$4 sm:$0xff]  }
  0x63   :  { %3300 = vmatprep.subr.bf16.mxu1 %v5062_v37  ;;  %v5117_v11 = vld [vmem:[#allocation5 + $0x6c4] ss:$16 sps:$4 sm:$0xff]   ;;  %v5115_v13 = vld [vmem:[#allocation5 + $0x6c0] ss:$16 sps:$4 sm:$0xff]   ;;  %v6092_v37 = vcombine.high %v6084_v33, %v6084_v33 }
  0x64   :  { %v5120_v14 = vld [vmem:[#allocation5 + $0x4a4] ss:$16 sps:$4 sm:$0xff]   ;;  %v5118_v16 = vld [vmem:[#allocation5 + $0x4a0] ss:$16 sps:$4 sm:$0xff]  }
  0x65   :  { %3260 = vmatpush2.bf16.msra.mxu0 %v5064_v38  ;;  %v5123_v15 = vld [vmem:[#allocation5 + $0x6a4] ss:$16 sps:$4 sm:$0xff]   ;;  %v5121_v17 = vld [vmem:[#allocation5 + $0x6a0] ss:$16 sps:$4 sm:$0xff]  }
  0x66   :  { %3301 = vmatpush2.bf16.msra.mxu1 %v5065_v39  ;;  %3261 = vmatprep.subr.bf16.mxu0 %v5066_v40  ;;  %v5126_v18 = vld [vmem:[#allocation5 + $0x484] ss:$16 sps:$4 sm:$0xff]   ;;  %v5124_v20 = vld [vmem:[#allocation5 + $0x480] ss:$16 sps:$4 sm:$0xff]  }
  0x67   :  { %3302 = vmatprep.subr.bf16.mxu1 %v5068_v41  ;;  %v5129_v19 = vld [vmem:[#allocation5 + $0x684] ss:$16 sps:$4 sm:$0xff]   ;;  %v5127_v21 = vld [vmem:[#allocation5 + $0x680] ss:$16 sps:$4 sm:$0xff]  }
  0x68   :  { %v5132_v22 = vld [vmem:[#allocation5 + $0x464] ss:$16 sps:$4 sm:$0xff]   ;;  %v5130_v24 = vld [vmem:[#allocation5 + $0x460] ss:$16 sps:$4 sm:$0xff]  }
  0x69   :  { %3262 = vmatpush2.bf16.msra.mxu0 %v5070_v42  ;;  %v5135_v23 = vld [vmem:[#allocation5 + $0x664] ss:$16 sps:$4 sm:$0xff]   ;;  %v5133_v25 = vld [vmem:[#allocation5 + $0x660] ss:$16 sps:$4 sm:$0xff]  }
  0x6a   :  { %3303 = vmatpush2.bf16.msra.mxu1 %v5071_v43  ;;  %3263 = vmatprep.subr.bf16.mxu0 %v5072_v44  ;;  %v5138_v26 = vld [vmem:[#allocation5 + $0x444] ss:$16 sps:$4 sm:$0xff]   ;;  %v5136_v28 = vld [vmem:[#allocation5 + $0x440] ss:$16 sps:$4 sm:$0xff]  }
  0x6b   :  { %3304 = vmatprep.subr.bf16.mxu1 %v5074_v45  ;;  %v5141_v27 = vld [vmem:[#allocation5 + $0x644] ss:$16 sps:$4 sm:$0xff]   ;;  %v5139_v29 = vld [vmem:[#allocation5 + $0x640] ss:$16 sps:$4 sm:$0xff]  }
  0x6c   :  { %v5144_v30 = vld [vmem:[#allocation5 + $0x424] ss:$16 sps:$4 sm:$0xff]   ;;  %v5142_v34 = vld [vmem:[#allocation5 + $0x420] ss:$16 sps:$4 sm:$0xff]  }
  0x6d   :  { %3264 = vmatpush2.bf16.msra.mxu0 %v5076_v49  ;;  %v5147_v31 = vld [vmem:[#allocation5 + $0x624] ss:$16 sps:$4 sm:$0xff]   ;;  %v5145_v35 = vld [vmem:[#allocation5 + $0x620] ss:$16 sps:$4 sm:$0xff]  }
  0x6e   :  { %3305 = vmatpush2.bf16.msra.mxu1 %v5077_v50  ;;  %3265 = vmatprep.subr.bf16.mxu0 %v5078_v52  ;;  %v6082_v32 = vld [vmem:[#allocation2 + $0x10] sm:$0xff] }
  0x6f   :  { %3306 = vmatprep.subr.bf16.mxu1 %v5080_v53  ;;  %v6088_v36 = vcombine.high %v6082_v32, %v6082_v32  ;;  %v5150_v38 = vld [vmem:[#allocation5 + $0x404] ss:$16 sps:$4 sm:$0xff]   ;;  %v5148_v40 = vld [vmem:[#allocation5 + $0x400] ss:$16 sps:$4 sm:$0xff]  }
  0x70   :  { %v5153_v39 = vld [vmem:[#allocation5 + $0x604] ss:$16 sps:$4 sm:$0xff]   ;;  %v5151_v41 = vld [vmem:[#allocation5 + $0x600] ss:$16 sps:$4 sm:$0xff]  }
  0x71   :  { %3266 = vmatpush2.bf16.msra.mxu0 %v5082_v54  ;;  %v5156_v42 = vld [vmem:[#allocation5 + $0x5e4] ss:$16 sps:$4 sm:$0xff]   ;;  %v5154_v44 = vld [vmem:[#allocation5 + $0x5e0] ss:$16 sps:$4 sm:$0xff]  }
  0x72   :  { %3307 = vmatpush2.bf16.msra.mxu1 %v5083_v55  ;;  %3267 = vmatprep.subr.bf16.mxu0 %v5084_v56  ;;  %v5159_v43 = vld [vmem:[#allocation5 + $0x7e4] ss:$16 sps:$4 sm:$0xff]   ;;  %v5157_v45 = vld [vmem:[#allocation5 + $0x7e0] ss:$16 sps:$4 sm:$0xff]  }
  0x73   :  { %3308 = vmatprep.subr.bf16.mxu1 %v5086_v57  ;;  %v5162_v46 = vld [vmem:[#allocation5 + $0x5c4] ss:$16 sps:$4 sm:$0xff]   ;;  %v5160_v49 = vld [vmem:[#allocation5 + $0x5c0] ss:$16 sps:$4 sm:$0xff]  }
  0x74   :  { %v5165_v48 = vld [vmem:[#allocation5 + $0x7c4] ss:$16 sps:$4 sm:$0xff]   ;;  %v5163_v50 = vld [vmem:[#allocation5 + $0x7c0] ss:$16 sps:$4 sm:$0xff]  }
  0x75   :  { %3268 = vmatpush2.bf16.msra.mxu0 %v5088_v58  ;;  %v5168_v52 = vld [vmem:[#allocation5 + $0x5a4] ss:$16 sps:$4 sm:$0xff]   ;;  %v5166_v54 = vld [vmem:[#allocation5 + $0x5a0] ss:$16 sps:$4 sm:$0xff]  }
  0x76   :  { %3309 = vmatpush2.bf16.msra.mxu1 %v5089_v59  ;;  %3269 = vmatprep.subr.bf16.mxu0 %v5090_v60  ;;  %v5171_v53 = vld [vmem:[#allocation5 + $0x7a4] ss:$16 sps:$4 sm:$0xff]   ;;  %v5169_v55 = vld [vmem:[#allocation5 + $0x7a0] ss:$16 sps:$4 sm:$0xff]  }
  0x77   :  { %3310 = vmatprep.subr.bf16.mxu1 %v5092_v61  ;;  %v5174_v56 = vld [vmem:[#allocation5 + $0x584] ss:$16 sps:$4 sm:$0xff]   ;;  %v5172_v58 = vld [vmem:[#allocation5 + $0x580] ss:$16 sps:$4 sm:$0xff]  }
  0x78   :  { %v5177_v57 = vld [vmem:[#allocation5 + $0x784] ss:$16 sps:$4 sm:$0xff]   ;;  %v5175_v59 = vld [vmem:[#allocation5 + $0x780] ss:$16 sps:$4 sm:$0xff]  }
  0x79   :  { %3270 = vmatpush2.bf16.msra.mxu0 %v5094_v62  ;;  %v5180_v60 = vld [vmem:[#allocation5 + $0x564] ss:$16 sps:$4 sm:$0xff]   ;;  %v5178_v62 = vld [vmem:[#allocation5 + $0x560] ss:$16 sps:$4 sm:$0xff]  }
  0x7a   :  { %3311 = vmatpush2.bf16.msra.mxu1 %v5095_v63  ;;  %3271 = vmatprep.subr.bf16.mxu0 %v5096_v0  ;;  %v5183_v61 = vld [vmem:[#allocation5 + $0x764] ss:$16 sps:$4 sm:$0xff]   ;;  %v5181_v63 = vld [vmem:[#allocation5 + $0x760] ss:$16 sps:$4 sm:$0xff]  }
  0x7b   :  { %3312 = vmatprep.subr.bf16.mxu1 %v5098_v1  ;;  %v5186_v0 = vld [vmem:[#allocation5 + $0x544] ss:$16 sps:$4 sm:$0xff]  }
  0x7c   :  { %v5189_v1 = vld [vmem:[#allocation5 + $0x744] ss:$16 sps:$4 sm:$0xff]  }
  0x7d   :  { %3272 = vmatpush2.bf16.msra.mxu0 %v5100_v2  ;;  %v5184_v2 = vld [vmem:[#allocation5 + $0x540] ss:$16 sps:$4 sm:$0xff]  }
  0x7e   :  { %3313 = vmatpush2.bf16.msra.mxu1 %v5101_v3  ;;  %3323 = vmatprep.subr.bf16.mxu0 %v5108_v4  ;;  %v5187_v3 = vld [vmem:[#allocation5 + $0x740] ss:$16 sps:$4 sm:$0xff]   ;;  %v5192_v4 = vld [vmem:[#allocation5 + $0x524] ss:$16 sps:$4 sm:$0xff]  }
  0x7f   :  { %3364 = vmatprep.subr.bf16.mxu1 %v5111_v5  ;;  %v5195_v5 = vld [vmem:[#allocation5 + $0x724] ss:$16 sps:$4 sm:$0xff]  }
  0x80   :  { %3274 = vmatmul.mubr.bf16.vlgmr.msra.gmra.mxu0 %v6076_v6 }
  0x81   :  { %3315 = vmatmul.mubr.bf16.vlgmr.msra.gmra.mxu1 %v6078_v7  ;;  %3324 = vmatpush1.bf16.msra.mxu0 %v5106_v8  ;;  %v5190_v8 = vld [vmem:[#allocation5 + $0x520] ss:$16 sps:$4 sm:$0xff]  }
  0x82   :  { %3365 = vmatpush1.bf16.msra.mxu1 %v5109_v9  ;;  %3325 = vmatprep.subr.bf16.mxu0 %v5114_v10  ;;  %v5193_v9 = vld [vmem:[#allocation5 + $0x720] ss:$16 sps:$4 sm:$0xff]   ;;  %v5198_v10 = vld [vmem:[#allocation5 + $0x504] ss:$16 sps:$4 sm:$0xff]  }
  0x83   :  { %3366 = vmatprep.subr.bf16.mxu1 %v5117_v11  ;;  %3355 = vmatprep.mubr.bf16.mxu0 %v6088_v36  ;;  %v5201_v11 = vld [vmem:[#allocation5 + $0x704] ss:$16 sps:$4 sm:$0xff]  }
  0x84   :  { %3396 = vmatprep.mubr.bf16.mxu1 %v6092_v37 }
  0x85   :  { %3326 = vmatpush1.bf16.msra.mxu0 %v5112_v12  ;;  %v5196_v12 = vld [vmem:[#allocation5 + $0x500] ss:$16 sps:$4 sm:$0xff]  }
  0x86   :  { %3367 = vmatpush1.bf16.msra.mxu1 %v5115_v13  ;;  %3327 = vmatprep.subr.bf16.mxu0 %v5120_v14  ;;  %v5199_v13 = vld [vmem:[#allocation5 + $0x700] ss:$16 sps:$4 sm:$0xff]   ;;  %v5208_v14 = vld [vmem:[#allocation5 + $0x8e4] ss:$16 sps:$4 sm:$0xff]  }
  0x87   :  { %3368 = vmatprep.subr.bf16.mxu1 %v5123_v15  ;;  %v5211_v15 = vld [vmem:[#allocation5 + $0xae4] ss:$16 sps:$4 sm:$0xff]  }
  0x89   :  { %3328 = vmatpush1.bf16.msra.mxu0 %v5118_v16  ;;  %v6098_v16 = vcombine.low %v6082_v32, %v6082_v32  ;;  %v5226_v32 = vld [vmem:[#allocation5 + $0x884] ss:$16 sps:$4 sm:$0xff]  }
  0x8a   :  { %3369 = vmatpush1.bf16.msra.mxu1 %v5121_v17  ;;  %3329 = vmatprep.subr.bf16.mxu0 %v5126_v18  ;;  %v6102_v17 = vcombine.low %v6084_v33, %v6084_v33  ;;  %v5206_v18 = vld [vmem:[#allocation5 + $0x8e0] ss:$16 sps:$4 sm:$0xff]   ;;  %v5229_v33 = vld [vmem:[#allocation5 + $0xa84] ss:$16 sps:$4 sm:$0xff]  }
  0x8b   :  { %3370 = vmatprep.subr.bf16.mxu1 %v5129_v19  ;;  %v5209_v19 = vld [vmem:[#allocation5 + $0xae0] ss:$16 sps:$4 sm:$0xff]  }
  0x8d   :  { %3330 = vmatpush1.bf16.msra.mxu0 %v5124_v20  ;;  %v5214_v20 = vld [vmem:[#allocation5 + $0x8c4] ss:$16 sps:$4 sm:$0xff]  }
  0x8e   :  { %3371 = vmatpush1.bf16.msra.mxu1 %v5127_v21  ;;  %3331 = vmatprep.subr.bf16.mxu0 %v5132_v22  ;;  %v5217_v21 = vld [vmem:[#allocation5 + $0xac4] ss:$16 sps:$4 sm:$0xff]  }
  0x8f   :  { %3372 = vmatprep.subr.bf16.mxu1 %v5135_v23  ;;  %v6104_v22 = vld [vmem:[#allocation2 + $0x20] sm:$0xff]  ;;  %v6106_v23 = vld [vmem:[#allocation2 + $0x28] sm:$0xff] }
  0x91   :  { %3332 = vmatpush1.bf16.msra.mxu0 %v5130_v24  ;;  %v6110_v24 = vcombine.high %v6104_v22, %v6104_v22 }
  0x92   :  { %3373 = vmatpush1.bf16.msra.mxu1 %v5133_v25  ;;  %3333 = vmatprep.subr.bf16.mxu0 %v5138_v26  ;;  %v6114_v25 = vcombine.high %v6106_v23, %v6106_v23  ;;  %v5212_v26 = vld [vmem:[#allocation5 + $0x8c0] ss:$16 sps:$4 sm:$0xff]  }
  0x93   :  { %3374 = vmatprep.subr.bf16.mxu1 %v5141_v27  ;;  %v5215_v27 = vld [vmem:[#allocation5 + $0xac0] ss:$16 sps:$4 sm:$0xff]  }
  0x95   :  { %3334 = vmatpush1.bf16.msra.mxu0 %v5136_v28  ;;  %v5220_v28 = vld [vmem:[#allocation5 + $0x8a4] ss:$16 sps:$4 sm:$0xff]  }
  0x96   :  { %3375 = vmatpush1.bf16.msra.mxu1 %v5139_v29  ;;  %3335 = vmatprep.subr.bf16.mxu0 %v5144_v30  ;;  %v5223_v29 = vld [vmem:[#allocation5 + $0xaa4] ss:$16 sps:$4 sm:$0xff]   ;;  %v5218_v30 = vld [vmem:[#allocation5 + $0x8a0] ss:$16 sps:$4 sm:$0xff]  }
  0x97   :  { %3376 = vmatprep.subr.bf16.mxu1 %v5147_v31  ;;  %v5221_v31 = vld [vmem:[#allocation5 + $0xaa0] ss:$16 sps:$4 sm:$0xff]  }
  0x99   :  { %3336 = vmatpush1.bf16.msra.mxu0 %v5142_v34  ;;  %v5224_v34 = vld [vmem:[#allocation5 + $0x880] ss:$16 sps:$4 sm:$0xff]  }
  0x9a   :  { %3377 = vmatpush1.bf16.msra.mxu1 %v5145_v35  ;;  %3337 = vmatprep.subr.bf16.mxu0 %v5150_v38  ;;  %v5227_v35 = vld [vmem:[#allocation5 + $0xa80] ss:$16 sps:$4 sm:$0xff]   ;;  %v5232_v38 = vld [vmem:[#allocation5 + $0x864] ss:$16 sps:$4 sm:$0xff]  }
  0x9b   :  { %3378 = vmatprep.subr.bf16.mxu1 %v5153_v39  ;;  %v5235_v39 = vld [vmem:[#allocation5 + $0xa64] ss:$16 sps:$4 sm:$0xff]  }
  0x9d   :  { %3338 = vmatpush1.bf16.msra.mxu0 %v5148_v40  ;;  %v5230_v40 = vld [vmem:[#allocation5 + $0x860] ss:$16 sps:$4 sm:$0xff]  }
  0x9e   :  { %3379 = vmatpush1.bf16.msra.mxu1 %v5151_v41  ;;  %3339 = vmatprep.subr.bf16.mxu0 %v5156_v42  ;;  %v5233_v41 = vld [vmem:[#allocation5 + $0xa60] ss:$16 sps:$4 sm:$0xff]   ;;  %v5238_v42 = vld [vmem:[#allocation5 + $0x844] ss:$16 sps:$4 sm:$0xff]  }
  0x9f   :  { %3380 = vmatprep.subr.bf16.mxu1 %v5159_v43  ;;  %v5241_v43 = vld [vmem:[#allocation5 + $0xa44] ss:$16 sps:$4 sm:$0xff]  }
  0xa1   :  { %3340 = vmatpush2.bf16.msra.mxu0 %v5154_v44  ;;  %v5236_v44 = vld [vmem:[#allocation5 + $0x840] ss:$16 sps:$4 sm:$0xff]  }
  0xa2   :  { %3381 = vmatpush2.bf16.msra.mxu1 %v5157_v45  ;;  %3341 = vmatprep.subr.bf16.mxu0 %v5162_v46  ;;  %v5239_v45 = vld [vmem:[#allocation5 + $0xa40] ss:$16 sps:$4 sm:$0xff]   ;;  %v5244_v46 = vld [vmem:[#allocation5 + $0x824] ss:$16 sps:$4 sm:$0xff]  }
  0xa3   :  { %3382 = vmatprep.subr.bf16.mxu1 %v5165_v48  ;;  %v5247_v48 = vld [vmem:[#allocation5 + $0xa24] ss:$16 sps:$4 sm:$0xff]  }
  0xa5   :  { %3342 = vmatpush2.bf16.msra.mxu0 %v5160_v49  ;;  %v5242_v49 = vld [vmem:[#allocation5 + $0x820] ss:$16 sps:$4 sm:$0xff]  }
  0xa6   :  { %3383 = vmatpush2.bf16.msra.mxu1 %v5163_v50  ;;  %3343 = vmatprep.subr.bf16.mxu0 %v5168_v52  ;;  %v5245_v50 = vld [vmem:[#allocation5 + $0xa20] ss:$16 sps:$4 sm:$0xff]   ;;  %v5250_v52 = vld [vmem:[#allocation5 + $0x804] ss:$16 sps:$4 sm:$0xff]  }
  0xa7   :  { %3384 = vmatprep.subr.bf16.mxu1 %v5171_v53  ;;  %v5253_v53 = vld [vmem:[#allocation5 + $0xa04] ss:$16 sps:$4 sm:$0xff]  }
  0xa9   :  { %3344 = vmatpush2.bf16.msra.mxu0 %v5166_v54  ;;  %v5248_v54 = vld [vmem:[#allocation5 + $0x800] ss:$16 sps:$4 sm:$0xff]  }
  0xaa   :  { %3385 = vmatpush2.bf16.msra.mxu1 %v5169_v55  ;;  %3345 = vmatprep.subr.bf16.mxu0 %v5174_v56  ;;  %v5251_v55 = vld [vmem:[#allocation5 + $0xa00] ss:$16 sps:$4 sm:$0xff]   ;;  %v5256_v56 = vld [vmem:[#allocation5 + $0x9e4] ss:$16 sps:$4 sm:$0xff]  }
  0xab   :  { %3386 = vmatprep.subr.bf16.mxu1 %v5177_v57  ;;  %v5259_v57 = vld [vmem:[#allocation5 + $0xbe4] ss:$16 sps:$4 sm:$0xff]  }
  0xad   :  { %3346 = vmatpush2.bf16.msra.mxu0 %v5172_v58  ;;  %v5254_v58 = vld [vmem:[#allocation5 + $0x9e0] ss:$16 sps:$4 sm:$0xff]  }
  0xae   :  { %3387 = vmatpush2.bf16.msra.mxu1 %v5175_v59  ;;  %3347 = vmatprep.subr.bf16.mxu0 %v5180_v60  ;;  %v5257_v59 = vld [vmem:[#allocation5 + $0xbe0] ss:$16 sps:$4 sm:$0xff]   ;;  %v5262_v60 = vld [vmem:[#allocation5 + $0x9c4] ss:$16 sps:$4 sm:$0xff]  }
  0xaf   :  { %3388 = vmatprep.subr.bf16.mxu1 %v5183_v61  ;;  %v5265_v61 = vld [vmem:[#allocation5 + $0xbc4] ss:$16 sps:$4 sm:$0xff]  }
  0xb1   :  { %3348 = vmatpush2.bf16.msra.mxu0 %v5178_v62  ;;  %v5260_v62 = vld [vmem:[#allocation5 + $0x9c0] ss:$16 sps:$4 sm:$0xff]  }
  0xb2   :  { %3389 = vmatpush2.bf16.msra.mxu1 %v5181_v63  ;;  %3349 = vmatprep.subr.bf16.mxu0 %v5186_v0  ;;  %v5263_v63 = vld [vmem:[#allocation5 + $0xbc0] ss:$16 sps:$4 sm:$0xff]   ;;  %v5268_v0 = vld [vmem:[#allocation5 + $0x9a4] ss:$16 sps:$4 sm:$0xff]  }
  0xb3   :  { %3390 = vmatprep.subr.bf16.mxu1 %v5189_v1  ;;  %v5271_v1 = vld [vmem:[#allocation5 + $0xba4] ss:$16 sps:$4 sm:$0xff]  }
  0xb5   :  { %3350 = vmatpush2.bf16.msra.mxu0 %v5184_v2  ;;  %v5266_v2 = vld [vmem:[#allocation5 + $0x9a0] ss:$16 sps:$4 sm:$0xff]  }
  0xb6   :  { %3391 = vmatpush2.bf16.msra.mxu1 %v5187_v3  ;;  %3351 = vmatprep.subr.bf16.mxu0 %v5192_v4  ;;  %v5269_v3 = vld [vmem:[#allocation5 + $0xba0] ss:$16 sps:$4 sm:$0xff]   ;;  %v5274_v4 = vld [vmem:[#allocation5 + $0x984] ss:$16 sps:$4 sm:$0xff]  }
  0xb7   :  { %3392 = vmatprep.subr.bf16.mxu1 %v5195_v5  ;;  %v5277_v5 = vld [vmem:[#allocation5 + $0xb84] ss:$16 sps:$4 sm:$0xff]  }
  0xb9   :  { %3352 = vmatpush2.bf16.msra.mxu0 %v5190_v8  ;;  %v5272_v8 = vld [vmem:[#allocation5 + $0x980] ss:$16 sps:$4 sm:$0xff]  }
  0xba   :  { %3393 = vmatpush2.bf16.msra.mxu1 %v5193_v9  ;;  %3353 = vmatprep.subr.bf16.mxu0 %v5198_v10  ;;  %v5275_v9 = vld [vmem:[#allocation5 + $0xb80] ss:$16 sps:$4 sm:$0xff]   ;;  %v5280_v10 = vld [vmem:[#allocation5 + $0x964] ss:$16 sps:$4 sm:$0xff]  }
  0xbb   :  { %3394 = vmatprep.subr.bf16.mxu1 %v5201_v11  ;;  %v5283_v11 = vld [vmem:[#allocation5 + $0xb64] ss:$16 sps:$4 sm:$0xff]  }
  0xbd   :  { %3354 = vmatpush2.bf16.msra.mxu0 %v5196_v12  ;;  %v5278_v12 = vld [vmem:[#allocation5 + $0x960] ss:$16 sps:$4 sm:$0xff]  }
  0xbe   :  { %3395 = vmatpush2.bf16.msra.mxu1 %v5199_v13  ;;  %3405 = vmatprep.subr.bf16.mxu0 %v5208_v14  ;;  %v5281_v13 = vld [vmem:[#allocation5 + $0xb60] ss:$16 sps:$4 sm:$0xff]   ;;  %v5286_v14 = vld [vmem:[#allocation5 + $0x944] ss:$16 sps:$4 sm:$0xff]  }
  0xbf   :  { %3446 = vmatprep.subr.bf16.mxu1 %v5211_v15  ;;  %v5289_v15 = vld [vmem:[#allocation5 + $0xb44] ss:$16 sps:$4 sm:$0xff]  }
  0xc0   :  { %3356 = vmatmul.mubr.bf16.vlgmr.msra.gmra.mxu0 %v6098_v16 }
  0xc1   :  { %3397 = vmatmul.mubr.bf16.vlgmr.msra.gmra.mxu1 %v6102_v17  ;;  %3406 = vmatpush1.bf16.msra.mxu0 %v5206_v18  ;;  %v5284_v18 = vld [vmem:[#allocation5 + $0x940] ss:$16 sps:$4 sm:$0xff]  }
  0xc2   :  { %3447 = vmatpush1.bf16.msra.mxu1 %v5209_v19  ;;  %3407 = vmatprep.subr.bf16.mxu0 %v5214_v20  ;;  %v5287_v19 = vld [vmem:[#allocation5 + $0xb40] ss:$16 sps:$4 sm:$0xff]   ;;  %v5292_v20 = vld [vmem:[#allocation5 + $0x924] ss:$16 sps:$4 sm:$0xff]  }
  0xc3   :  { %3448 = vmatprep.subr.bf16.mxu1 %v5217_v21  ;;  %3437 = vmatprep.mubr.bf16.mxu0 %v6110_v24  ;;  %v5295_v21 = vld [vmem:[#allocation5 + $0xb24] ss:$16 sps:$4 sm:$0xff]  }
  0xc4   :  { %3478 = vmatprep.mubr.bf16.mxu1 %v6114_v25 }
  0xc5   :  { %3408 = vmatpush1.bf16.msra.mxu0 %v5212_v26  ;;  %v5290_v26 = vld [vmem:[#allocation5 + $0x920] ss:$16 sps:$4 sm:$0xff]  }
  0xc6   :  { %3449 = vmatpush1.bf16.msra.mxu1 %v5215_v27  ;;  %3409 = vmatprep.subr.bf16.mxu0 %v5220_v28  ;;  %v5293_v27 = vld [vmem:[#allocation5 + $0xb20] ss:$16 sps:$4 sm:$0xff]   ;;  %v5298_v28 = vld [vmem:[#allocation5 + $0x904] ss:$16 sps:$4 sm:$0xff]  }
  0xc7   :  { %3450 = vmatprep.subr.bf16.mxu1 %v5223_v29  ;;  %v5301_v29 = vld [vmem:[#allocation5 + $0xb04] ss:$16 sps:$4 sm:$0xff]  }
  0xc9   :  { %3410 = vmatpush1.bf16.msra.mxu0 %v5218_v30  ;;  %v5296_v30 = vld [vmem:[#allocation5 + $0x900] ss:$16 sps:$4 sm:$0xff]  }
  0xca   :  { %3451 = vmatpush1.bf16.msra.mxu1 %v5221_v31  ;;  %3411 = vmatprep.subr.bf16.mxu0 %v5226_v32  ;;  %v5299_v31 = vld [vmem:[#allocation5 + $0xb00] ss:$16 sps:$4 sm:$0xff]   ;;  %v5308_v32 = vld [vmem:[#allocation5 + $0xce4] ss:$16 sps:$4 sm:$0xff]  }
  0xcb   :  { %3452 = vmatprep.subr.bf16.mxu1 %v5229_v33  ;;  %v5311_v33 = vld [vmem:[#allocation5 + $0xee4] ss:$16 sps:$4 sm:$0xff]  }
  0xcd   :  { %3412 = vmatpush1.bf16.msra.mxu0 %v5224_v34  ;;  %v5306_v34 = vld [vmem:[#allocation5 + $0xce0] ss:$16 sps:$4 sm:$0xff]  }
  0xce   :  { %3453 = vmatpush1.bf16.msra.mxu1 %v5227_v35  ;;  %3413 = vmatprep.subr.bf16.mxu0 %v5232_v38  ;;  %v6120_v35 = vld [vmem:[#allocation2 + $0x30] sm:$0xff]  ;;  %v6124_v38 = vcombine.low %v6104_v22, %v6104_v22 }
  0xcf   :  { %3454 = vmatprep.subr.bf16.mxu1 %v5235_v39  ;;  %v6128_v39 = vcombine.low %v6106_v23, %v6106_v23  ;;  %v5312_v23 = vld [vmem:[#allocation5 + $0xcc0] ss:$16 sps:$4 sm:$0xff]  }
  0xd1   :  { %3414 = vmatpush1.bf16.msra.mxu0 %v5230_v40  ;;  %v6130_v40 = vld [vmem:[#allocation2 + $0x38] sm:$0xff] }
  0xd2   :  { %3455 = vmatpush1.bf16.msra.mxu1 %v5233_v41  ;;  %3415 = vmatprep.subr.bf16.mxu0 %v5238_v42  ;;  %v5309_v41 = vld [vmem:[#allocation5 + $0xee0] ss:$16 sps:$4 sm:$0xff]   ;;  %v5314_v42 = vld [vmem:[#allocation5 + $0xcc4] ss:$16 sps:$4 sm:$0xff]   ;;  %v6138_v22 = vcombine.high %v6130_v40, %v6130_v40 }
  0xd3   :  { %3456 = vmatprep.subr.bf16.mxu1 %v5241_v43  ;;  %v5317_v43 = vld [vmem:[#allocation5 + $0xec4] ss:$16 sps:$4 sm:$0xff]  }
  0xd5   :  { %3416 = vmatpush1.bf16.msra.mxu0 %v5236_v44  ;;  %v6134_v44 = vcombine.high %v6120_v35, %v6120_v35 }
  0xd6   :  { %3457 = vmatpush1.bf16.msra.mxu1 %v5239_v45  ;;  %3417 = vmatprep.subr.bf16.mxu0 %v5244_v46  ;;  %v5315_v45 = vld [vmem:[#allocation5 + $0xec0] ss:$16 sps:$4 sm:$0xff]   ;;  %v5320_v46 = vld [vmem:[#allocation5 + $0xca4] ss:$16 sps:$4 sm:$0xff]  }
  0xd7   :  { %3458 = vmatprep.subr.bf16.mxu1 %v5247_v48  ;;  %v5323_v48 = vld [vmem:[#allocation5 + $0xea4] ss:$16 sps:$4 sm:$0xff]  }
  0xd9   :  { %3418 = vmatpush1.bf16.msra.mxu0 %v5242_v49  ;;  %v5318_v49 = vld [vmem:[#allocation5 + $0xca0] ss:$16 sps:$4 sm:$0xff]  }
  0xda   :  { %3459 = vmatpush1.bf16.msra.mxu1 %v5245_v50  ;;  %3419 = vmatprep.subr.bf16.mxu0 %v5250_v52  ;;  %v5321_v50 = vld [vmem:[#allocation5 + $0xea0] ss:$16 sps:$4 sm:$0xff]   ;;  %v5326_v52 = vld [vmem:[#allocation5 + $0xc84] ss:$16 sps:$4 sm:$0xff]  }
  0xdb   :  { %3460 = vmatprep.subr.bf16.mxu1 %v5253_v53  ;;  %v5329_v53 = vld [vmem:[#allocation5 + $0xe84] ss:$16 sps:$4 sm:$0xff]  }
  0xdd   :  { %3420 = vmatpush1.bf16.msra.mxu0 %v5248_v54  ;;  %v5324_v54 = vld [vmem:[#allocation5 + $0xc80] ss:$16 sps:$4 sm:$0xff]  }
  0xde   :  { %3461 = vmatpush1.bf16.msra.mxu1 %v5251_v55  ;;  %3421 = vmatprep.subr.bf16.mxu0 %v5256_v56  ;;  %v5327_v55 = vld [vmem:[#allocation5 + $0xe80] ss:$16 sps:$4 sm:$0xff]   ;;  %v5332_v56 = vld [vmem:[#allocation5 + $0xc64] ss:$16 sps:$4 sm:$0xff]  }
  0xdf   :  { %3462 = vmatprep.subr.bf16.mxu1 %v5259_v57  ;;  %v5335_v57 = vld [vmem:[#allocation5 + $0xe64] ss:$16 sps:$4 sm:$0xff]  }
  0xe1   :  { %3422 = vmatpush2.bf16.msra.mxu0 %v5254_v58  ;;  %v5330_v58 = vld [vmem:[#allocation5 + $0xc60] ss:$16 sps:$4 sm:$0xff]  }
  0xe2   :  { %3463 = vmatpush2.bf16.msra.mxu1 %v5257_v59  ;;  %3423 = vmatprep.subr.bf16.mxu0 %v5262_v60  ;;  %v5333_v59 = vld [vmem:[#allocation5 + $0xe60] ss:$16 sps:$4 sm:$0xff]   ;;  %v5338_v60 = vld [vmem:[#allocation5 + $0xc44] ss:$16 sps:$4 sm:$0xff]  }
  0xe3   :  { %3464 = vmatprep.subr.bf16.mxu1 %v5265_v61  ;;  %v5341_v61 = vld [vmem:[#allocation5 + $0xe44] ss:$16 sps:$4 sm:$0xff]  }
  0xe5   :  { %3424 = vmatpush2.bf16.msra.mxu0 %v5260_v62  ;;  %v5336_v62 = vld [vmem:[#allocation5 + $0xc40] ss:$16 sps:$4 sm:$0xff]  }
  0xe6   :  { %3465 = vmatpush2.bf16.msra.mxu1 %v5263_v63  ;;  %3425 = vmatprep.subr.bf16.mxu0 %v5268_v0  ;;  %v5339_v63 = vld [vmem:[#allocation5 + $0xe40] ss:$16 sps:$4 sm:$0xff]   ;;  %v5344_v0 = vld [vmem:[#allocation5 + $0xc24] ss:$16 sps:$4 sm:$0xff]  }
  0xe7   :  { %3466 = vmatprep.subr.bf16.mxu1 %v5271_v1  ;;  %v5347_v1 = vld [vmem:[#allocation5 + $0xe24] ss:$16 sps:$4 sm:$0xff]  }
  0xe9   :  { %3426 = vmatpush2.bf16.msra.mxu0 %v5266_v2  ;;  %v5342_v2 = vld [vmem:[#allocation5 + $0xc20] ss:$16 sps:$4 sm:$0xff]  }
  0xea   :  { %3467 = vmatpush2.bf16.msra.mxu1 %v5269_v3  ;;  %3427 = vmatprep.subr.bf16.mxu0 %v5274_v4  ;;  %v5345_v3 = vld [vmem:[#allocation5 + $0xe20] ss:$16 sps:$4 sm:$0xff]   ;;  %v5350_v4 = vld [vmem:[#allocation5 + $0xc04] ss:$16 sps:$4 sm:$0xff]  }
  0xeb   :  { %3468 = vmatprep.subr.bf16.mxu1 %v5277_v5  ;;  %v5353_v5 = vld [vmem:[#allocation5 + $0xe04] ss:$16 sps:$4 sm:$0xff]  }
  0xed   :  { %3428 = vmatpush2.bf16.msra.mxu0 %v5272_v8  ;;  %v5348_v8 = vld [vmem:[#allocation5 + $0xc00] ss:$16 sps:$4 sm:$0xff]  }
  0xee   :  { %3469 = vmatpush2.bf16.msra.mxu1 %v5275_v9  ;;  %3429 = vmatprep.subr.bf16.mxu0 %v5280_v10  ;;  %v5351_v9 = vld [vmem:[#allocation5 + $0xe00] ss:$16 sps:$4 sm:$0xff]   ;;  %v5356_v10 = vld [vmem:[#allocation5 + $0xde4] ss:$16 sps:$4 sm:$0xff]  }
  0xef   :  { %3470 = vmatprep.subr.bf16.mxu1 %v5283_v11  ;;  %v5359_v11 = vld [vmem:[#allocation5 + $0xfe4] ss:$16 sps:$4 sm:$0xff]  }
  0xf1   :  { %3430 = vmatpush2.bf16.msra.mxu0 %v5278_v12  ;;  %v5354_v12 = vld [vmem:[#allocation5 + $0xde0] ss:$16 sps:$4 sm:$0xff]  }
  0xf2   :  { %3471 = vmatpush2.bf16.msra.mxu1 %v5281_v13  ;;  %3431 = vmatprep.subr.bf16.mxu0 %v5286_v14  ;;  %v5357_v13 = vld [vmem:[#allocation5 + $0xfe0] ss:$16 sps:$4 sm:$0xff]   ;;  %v5362_v14 = vld [vmem:[#allocation5 + $0xdc4] ss:$16 sps:$4 sm:$0xff]  }
  0xf3   :  { %3472 = vmatprep.subr.bf16.mxu1 %v5289_v15  ;;  %v5365_v15 = vld [vmem:[#allocation5 + $0xfc4] ss:$16 sps:$4 sm:$0xff]  }
  0xf5   :  { %3432 = vmatpush2.bf16.msra.mxu0 %v5284_v18  ;;  %v5360_v18 = vld [vmem:[#allocation5 + $0xdc0] ss:$16 sps:$4 sm:$0xff]  }
  0xf6   :  { %3473 = vmatpush2.bf16.msra.mxu1 %v5287_v19  ;;  %3433 = vmatprep.subr.bf16.mxu0 %v5292_v20  ;;  %v5363_v19 = vld [vmem:[#allocation5 + $0xfc0] ss:$16 sps:$4 sm:$0xff]   ;;  %v5368_v20 = vld [vmem:[#allocation5 + $0xda4] ss:$16 sps:$4 sm:$0xff]  }
  0xf7   :  { %3474 = vmatprep.subr.bf16.mxu1 %v5295_v21  ;;  %v5371_v21 = vld [vmem:[#allocation5 + $0xfa4] ss:$16 sps:$4 sm:$0xff]  }
  0xf9   :  { %3434 = vmatpush2.bf16.msra.mxu0 %v5290_v26  ;;  %v5366_v26 = vld [vmem:[#allocation5 + $0xda0] ss:$16 sps:$4 sm:$0xff]  }
  0xfa   :  { %3475 = vmatpush2.bf16.msra.mxu1 %v5293_v27  ;;  %3435 = vmatprep.subr.bf16.mxu0 %v5298_v28  ;;  %v5369_v27 = vld [vmem:[#allocation5 + $0xfa0] ss:$16 sps:$4 sm:$0xff]   ;;  %v5374_v28 = vld [vmem:[#allocation5 + $0xd84] ss:$16 sps:$4 sm:$0xff]  }
  0xfb   :  { %3476 = vmatprep.subr.bf16.mxu1 %v5301_v29  ;;  %v5377_v29 = vld [vmem:[#allocation5 + $0xf84] ss:$16 sps:$4 sm:$0xff]  }
  0xfd   :  { %3436 = vmatpush2.bf16.msra.mxu0 %v5296_v30  ;;  %v5372_v30 = vld [vmem:[#allocation5 + $0xd80] ss:$16 sps:$4 sm:$0xff]  }
  0xfe   :  { %3477 = vmatpush2.bf16.msra.mxu1 %v5299_v31  ;;  %3487 = vmatprep.subr.bf16.mxu0 %v5308_v32  ;;  %v5375_v31 = vld [vmem:[#allocation5 + $0xf80] ss:$16 sps:$4 sm:$0xff]   ;;  %v5380_v32 = vld [vmem:[#allocation5 + $0xd64] ss:$16 sps:$4 sm:$0xff]  }
  0xff   :  { %3528 = vmatprep.subr.bf16.mxu1 %v5311_v33  ;;  %v5383_v33 = vld [vmem:[#allocation5 + $0xf64] ss:$16 sps:$4 sm:$0xff]  }
 0x100   :  { %3438 = vmatmul.mubr.bf16.vlgmr.msra.gmra.mxu0 %v6124_v38 }
 0x101   :  { %3479 = vmatmul.mubr.bf16.vlgmr.msra.gmra.mxu1 %v6128_v39  ;;  %3488 = vmatpush1.bf16.msra.mxu0 %v5306_v34  ;;  %v5378_v34 = vld [vmem:[#allocation5 + $0xd60] ss:$16 sps:$4 sm:$0xff]  }
 0x102   :  { %3529 = vmatpush1.bf16.msra.mxu1 %v5309_v41  ;;  %3489 = vmatprep.subr.bf16.mxu0 %v5314_v42  ;;  %v5381_v41 = vld [vmem:[#allocation5 + $0xf60] ss:$16 sps:$4 sm:$0xff]   ;;  %v5386_v42 = vld [vmem:[#allocation5 + $0xd44] ss:$16 sps:$4 sm:$0xff]  }
 0x103   :  { %3530 = vmatprep.subr.bf16.mxu1 %v5317_v43  ;;  %3519 = vmatprep.mubr.bf16.mxu0 %v6134_v44  ;;  %v5389_v43 = vld [vmem:[#allocation5 + $0xf44] ss:$16 sps:$4 sm:$0xff]  }
 0x104   :  { %3560 = vmatprep.mubr.bf16.mxu1 %v6138_v22 }
 0x105   :  { %3490 = vmatpush1.bf16.msra.mxu0 %v5312_v23  ;;  %v5384_v23 = vld [vmem:[#allocation5 + $0xd40] ss:$16 sps:$4 sm:$0xff]  }
 0x106   :  { %3531 = vmatpush1.bf16.msra.mxu1 %v5315_v45  ;;  %3491 = vmatprep.subr.bf16.mxu0 %v5320_v46  ;;  %v5387_v45 = vld [vmem:[#allocation5 + $0xf40] ss:$16 sps:$4 sm:$0xff]   ;;  %v605_v46 = vlaneseq }
 0x107   :  { %3532 = vmatprep.subr.bf16.mxu1 %v5323_v48  ;;  %v5392_v48 = vld [vmem:[#allocation5 + $0xd24] ss:$16 sps:$4 sm:$0xff]  }
 0x109   :  { %3492 = vmatpush1.bf16.msra.mxu0 %v5318_v49  ;;  %v5395_v49 = vld [vmem:[#allocation5 + $0xf24] ss:$16 sps:$4 sm:$0xff]  }
 0x10a   :  { %3533 = vmatpush1.bf16.msra.mxu1 %v5321_v50  ;;  %3493 = vmatprep.subr.bf16.mxu0 %v5326_v52  ;;  %v5390_v50 = vld [vmem:[#allocation5 + $0xd20] ss:$16 sps:$4 sm:$0xff]  }
 0x10b   :  { %3534 = vmatprep.subr.bf16.mxu1 %v5329_v53  ;;  %v5393_v52 = vld [vmem:[#allocation5 + $0xf20] ss:$16 sps:$4 sm:$0xff]   ;;  %v6144_v53 = vshrl.u32 %v605_v46, 7  ;;  %v5439_v46 = vld [vmem:[#allocation5 + $0x248] ss:$16 sps:$4 sm:$0xff]  }
 0x10d   :  { %3494 = vmatpush1.bf16.msra.mxu0 %v5324_v54  ;;  %v5398_v54 = vld [vmem:[#allocation5 + $0xd04] ss:$16 sps:$4 sm:$0xff]  }
 0x10e   :  { %3535 = vmatpush1.bf16.msra.mxu1 %v5327_v55  ;;  %3495 = vmatprep.subr.bf16.mxu0 %v5332_v56  ;;  %v5401_v55 = vld [vmem:[#allocation5 + $0xf04] ss:$16 sps:$4 sm:$0xff]   ;;  %v5396_v56 = vld [vmem:[#allocation5 + $0xd00] ss:$16 sps:$4 sm:$0xff]  }
 0x10f   :  { %3536 = vmatprep.subr.bf16.mxu1 %v5335_v57  ;;  %v5399_v57 = vld [vmem:[#allocation5 + $0xf00] ss:$16 sps:$4 sm:$0xff]  }
 0x111   :  { %3496 = vmatpush1.bf16.msra.mxu0 %v5330_v58  ;;  %v603_v58 = vld [vmem:[#allocation7] sm:$0xf] }
 0x112   :  { %3537 = vmatpush1.bf16.msra.mxu1 %v5333_v59  ;;  %3497 = vmatprep.subr.bf16.mxu0 %v5338_v60  ;;  %v607_v59 = vsub.s32 0, %v6144_v53  ;;  %v5408_v60 = vld [vmem:[#allocation5 + $0xec] ss:$16 sps:$4 sm:$0xff]  }
 0x113   :  { %3538 = vmatprep.subr.bf16.mxu1 %v5341_v61  ;;  %v5411_v61 = vld [vmem:[#allocation5 + $0x2ec] ss:$16 sps:$4 sm:$0xff]  }
 0x115   :  { %3498 = vmatpush1.bf16.msra.mxu0 %v5336_v62  ;;  %v611_v62 = vsub.s32 1, %v6144_v53 }
 0x116   :  { %3539 = vmatpush1.bf16.msra.mxu1 %v5339_v63  ;;  %3499 = vmatprep.subr.bf16.mxu0 %v5344_v0  ;;  %v6150_v63 = vcombine.low %v6120_v35, %v6120_v35  ;;  %v6154_v0 = vcombine.low %v6130_v40, %v6130_v40  ;;  %v5412_v40 = vld [vmem:[#allocation5 + $0xc8] ss:$16 sps:$4 sm:$0xff]  }
 0x117   :  { %3540 = vmatprep.subr.bf16.mxu1 %v5347_v1  ;;  %v5406_v1 = vld [vmem:[#allocation5 + $0xe8] ss:$16 sps:$4 sm:$0xff]  }
 0x119   :  { %3500 = vmatpush1.bf16.msra.mxu0 %v5342_v2  ;;  %v608_v2 = vrot.slane %v603_v58, %v607_v59 }
 0x11a   :  { %3541 = vmatpush1.bf16.msra.mxu1 %v5345_v3  ;;  %3501 = vmatprep.subr.bf16.mxu0 %v5350_v4  ;;  %v5409_v3 = vld [vmem:[#allocation5 + $0x2e8] ss:$16 sps:$4 sm:$0xff]   ;;  %v5414_v4 = vld [vmem:[#allocation5 + $0xcc] ss:$16 sps:$4 sm:$0xff]  }
 0x11b   :  { %3542 = vmatprep.subr.bf16.mxu1 %v5353_v5  ;;  %v5417_v5 = vld [vmem:[#allocation5 + $0x2cc] ss:$16 sps:$4 sm:$0xff]  }
 0x11d   :  { %3502 = vmatpush1.bf16.msra.mxu0 %v5348_v8  ;;  %v612_v8 = vrot.slane %v603_v58, %v611_v62  ;;  %v5456_v58 = vld [vmem:[#allocation5 + $0x1ec] ss:$16 sps:$4 sm:$0xff]  }
 0x11e   :  { %3543 = vmatpush1.bf16.msra.mxu1 %v5351_v9  ;;  %3503 = vmatprep.subr.bf16.mxu0 %v5356_v10 }
 0x11f   :  { %3544 = vmatprep.subr.bf16.mxu1 %v5359_v11  ;;  %v5415_v11 = vld [vmem:[#allocation5 + $0x2c8] ss:$16 sps:$4 sm:$0xff]  }
 0x121   :  { %3504 = vmatpush2.bf16.msra.mxu0 %v5354_v12 }
 0x122   :  { %3545 = vmatpush2.bf16.msra.mxu1 %v5357_v13  ;;  %3505 = vmatprep.subr.bf16.mxu0 %v5362_v14  ;;  %v5420_v14 = vld [vmem:[#allocation5 + $0xac] ss:$16 sps:$4 sm:$0xff]  }
 0x123   :  { %3546 = vmatprep.subr.bf16.mxu1 %v5365_v15  ;;  %v5423_v15 = vld [vmem:[#allocation5 + $0x2ac] ss:$16 sps:$4 sm:$0xff]  }
 0x125   :  { %3506 = vmatpush2.bf16.msra.mxu0 %v5360_v18 }
 0x126   :  { %3547 = vmatpush2.bf16.msra.mxu1 %v5363_v19  ;;  %3507 = vmatprep.subr.bf16.mxu0 %v5368_v20 }
 0x127   :  { %3548 = vmatprep.subr.bf16.mxu1 %v5371_v21 }
 0x129   :  { %3508 = vmatpush2.bf16.msra.mxu0 %v5366_v26  ;;  %v5418_v26 = vld [vmem:[#allocation5 + $0xa8] ss:$16 sps:$4 sm:$0xff]  }
 0x12a   :  { %3549 = vmatpush2.bf16.msra.mxu1 %v5369_v27  ;;  %3509 = vmatprep.subr.bf16.mxu0 %v5374_v28  ;;  %v5421_v28 = vld [vmem:[#allocation5 + $0x2a8] ss:$16 sps:$4 sm:$0xff]  }
 0x12b   :  { %3550 = vmatprep.subr.bf16.mxu1 %v5377_v29 }
 0x12d   :  { %3510 = vmatpush2.bf16.msra.mxu0 %v5372_v30 }
 0x12e   :  { %3551 = vmatpush2.bf16.msra.mxu1 %v5375_v31  ;;  %3511 = vmatprep.subr.bf16.mxu0 %v5380_v32  ;;  %v5426_v31 = vld [vmem:[#allocation5 + $0x8c] ss:$16 sps:$4 sm:$0xff]  }
 0x12f   :  { %3552 = vmatprep.subr.bf16.mxu1 %v5383_v33  ;;  %v5429_v32 = vld [vmem:[#allocation5 + $0x28c] ss:$16 sps:$4 sm:$0xff]   ;;  %v5424_v33 = vld [vmem:[#allocation5 + $0x88] ss:$16 sps:$4 sm:$0xff]  }
 0x131   :  { %3512 = vmatpush2.bf16.msra.mxu0 %v5378_v34  ;;  %v5435_v34 = vld [vmem:[#allocation5 + $0x26c] ss:$16 sps:$4 sm:$0xff]  }
 0x132   :  { %3553 = vmatpush2.bf16.msra.mxu1 %v5381_v41  ;;  %3513 = vmatprep.subr.bf16.mxu0 %v5386_v42  ;;  %v5430_v41 = vld [vmem:[#allocation5 + $0x68] ss:$16 sps:$4 sm:$0xff]  }
 0x133   :  { %3554 = vmatprep.subr.bf16.mxu1 %v5389_v43  ;;  %v5433_v42 = vld [vmem:[#allocation5 + $0x268] ss:$16 sps:$4 sm:$0xff]   ;;  %v5438_v43 = vld [vmem:[#allocation5 + $0x4c] ss:$16 sps:$4 sm:$0xff]  }
 0x135   :  { %3514 = vmatpush2.bf16.msra.mxu0 %v5384_v23  ;;  %v5441_v23 = vld [vmem:[#allocation5 + $0x24c] ss:$16 sps:$4 sm:$0xff]  }
 0x136   :  { %3555 = vmatpush2.bf16.msra.mxu1 %v5387_v45  ;;  %3515 = vmatprep.subr.bf16.mxu0 %v5392_v48  ;;  %v5436_v45 = vld [vmem:[#allocation5 + $0x48] ss:$16 sps:$4 sm:$0xff]   ;;  %v5444_v48 = vld [vmem:[#allocation5 + $0x2c] ss:$16 sps:$4 sm:$0xff]  }
 0x137   :  { %3556 = vmatprep.subr.bf16.mxu1 %v5395_v49  ;;  %v5447_v49 = vld [vmem:[#allocation5 + $0x22c] ss:$16 sps:$4 sm:$0xff]  }
 0x139   :  { %3516 = vmatpush2.bf16.msra.mxu0 %v5390_v50  ;;  %v5442_v50 = vld [vmem:[#allocation5 + $0x28] ss:$16 sps:$4 sm:$0xff]  }
 0x13a   :  { %3557 = vmatpush2.bf16.msra.mxu1 %v5393_v52  ;;  %3517 = vmatprep.subr.bf16.mxu0 %v5398_v54  ;;  %v5445_v52 = vld [vmem:[#allocation5 + $0x228] ss:$16 sps:$4 sm:$0xff]   ;;  %v5450_v54 = vld [vmem:[#allocation5 + $0xc] ss:$16 sps:$4 sm:$0xff]  }
 0x13b   :  { %3558 = vmatprep.subr.bf16.mxu1 %v5401_v55  ;;  %v5453_v55 = vld [vmem:[#allocation5 + $0x20c] ss:$16 sps:$4 sm:$0xff]  }
 0x13d   :  { %3518 = vmatpush2.bf16.msra.mxu0 %v5396_v56  ;;  %v5448_v56 = vld [vmem:[#allocation5 + $0x8] ss:$16 sps:$4 sm:$0xff]  }
 0x13e   :  { %3559 = vmatpush2.bf16.msra.mxu1 %v5399_v57  ;;  %3569 = vmatprep.subr.bf16.mxu0 %v5408_v60  ;;  %v5451_v57 = vld [vmem:[#allocation5 + $0x208] ss:$16 sps:$4 sm:$0xff]   ;;  %v5459_v60 = vld [vmem:[#allocation5 + $0x3ec] ss:$16 sps:$4 sm:$0xff]  }
 0x13f   :  { %3610 = vmatprep.subr.bf16.mxu1 %v5411_v61  ;;  %v5454_v61 = vld [vmem:[#allocation5 + $0x1e8] ss:$16 sps:$4 sm:$0xff]  }
 0x140   :  { %v3275_v35 = vpop.f32.mrf.mxu0  ;;  %3520 = vmatmul.mubr.bf16.vlgmr.msra.gmra.mxu0 %v6150_v63 }
 0x141   :  { %v3316_v9 = vpop.f32.mrf.mxu1  ;;  %3561 = vmatmul.mubr.bf16.vlgmr.msra.gmra.mxu1 %v6154_v0  ;;  %v3276_v10 = vadd.f32 %v3275_v35, %v608_v2  ;;  %3570 = vmatpush1.bf16.msra.mxu0 %v5406_v1  ;;  %v5457_v1 = vld [vmem:[#allocation5 + $0x3e8] ss:$16 sps:$4 sm:$0xff]   ;;  %v5462_v2 = vld [vmem:[#allocation5 + $0x1cc] ss:$16 sps:$4 sm:$0xff]  }
 0x142   :  { %3611 = vmatpush1.bf16.msra.mxu1 %v5409_v3  ;;  %v3277_v12 = vpop.f32.mrf.mxu0  ;;  %3571 = vmatprep.subr.bf16.mxu0 %v5414_v4  ;;  %v5465_v3 = vld [vmem:[#allocation5 + $0x3cc] ss:$16 sps:$4 sm:$0xff]   ;;  %v5460_v4 = vld [vmem:[#allocation5 + $0x1c8] ss:$16 sps:$4 sm:$0xff]  }
 0x143   :  { %v3318_v13 = vpop.f32.mrf.mxu1  ;;  %3612 = vmatprep.subr.bf16.mxu1 %v5417_v5  ;;  %v6162_v18 = vadd.f32 %v3316_v9, %v3276_v10  ;;  %v3278_v19 = vadd.f32 %v3277_v12, %v612_v8  ;;  %3601 = vmatprep.mubr.bf16.mxu0 %v6070_v47  ;;  %v5427_v47 = vld [vmem:[#allocation5 + $0x288] ss:$16 sps:$4 sm:$0xff]   ;;  %v5468_v8 = vld [vmem:[#allocation5 + $0x1ac] ss:$16 sps:$4 sm:$0xff]  }
 0x144   :  { %3642 = vmatprep.mubr.bf16.mxu1 %v6072_v51  ;;  %v3279_v20 = vpop.f32.mrf.mxu0  ;;  %v5432_v51 = vld [vmem:[#allocation5 + $0x6c] ss:$16 sps:$4 sm:$0xff]   ;;  %v5463_v5 = vld [vmem:[#allocation5 + $0x3c8] ss:$16 sps:$4 sm:$0xff]  }
 0x145   :  { %v3320_v21 = vpop.f32.mrf.mxu1  ;;  %v6166_v27 = vadd.f32 %v3318_v13, %v3278_v19  ;;  %3572 = vmatpush1.bf16.msra.mxu0 %v5412_v40  ;;  %v5471_v35 = vld [vmem:[#allocation5 + $0x3ac] ss:$16 sps:$4 sm:$0xff]   ;;  %v5466_v9 = vld [vmem:[#allocation5 + $0x1a8] ss:$16 sps:$4 sm:$0xff]  }
 0x146   :  { %3613 = vmatpush1.bf16.msra.mxu1 %v5415_v11  ;;  %v3280_v29 = vpop.f32.mrf.mxu0  ;;  %3573 = vmatprep.subr.bf16.mxu0 %v5420_v14  ;;  %v5469_v40 = vld [vmem:[#allocation5 + $0x3a8] ss:$16 sps:$4 sm:$0xff]   ;;  %v5474_v10 = vld [vmem:[#allocation5 + $0x18c] ss:$16 sps:$4 sm:$0xff]  }
 0x147   :  { %v3321_v30 = vpop.f32.mrf.mxu1  ;;  %3614 = vmatprep.subr.bf16.mxu1 %v5423_v15  ;;  %v5477_v11 = vld [vmem:[#allocation5 + $0x38c] ss:$16 sps:$4 sm:$0xff]   ;;  %v5472_v12 = vld [vmem:[#allocation5 + $0x188] ss:$16 sps:$4 sm:$0xff]  }
 0x148   :  { %v5475_v13 = vld [vmem:[#allocation5 + $0x388] ss:$16 sps:$4 sm:$0xff]   ;;  %v5480_v14 = vld [vmem:[#allocation5 + $0x16c] ss:$16 sps:$4 sm:$0xff]  }
 0x149   :  { %3574 = vmatpush1.bf16.msra.mxu0 %v5418_v26  ;;  %v5483_v15 = vld [vmem:[#allocation5 + $0x36c] ss:$16 sps:$4 sm:$0xff]   ;;  %v5478_v19 = vld [vmem:[#allocation5 + $0x168] ss:$16 sps:$4 sm:$0xff]  }
 0x14a   :  { %3615 = vmatpush1.bf16.msra.mxu1 %v5421_v28  ;;  %3575 = vmatprep.subr.bf16.mxu0 %v5426_v31  ;;  %v5481_v20 = vld [vmem:[#allocation5 + $0x368] ss:$16 sps:$4 sm:$0xff]   ;;  %v5486_v21 = vld [vmem:[#allocation5 + $0x14c] ss:$16 sps:$4 sm:$0xff]  }
 0x14b   :  { %3616 = vmatprep.subr.bf16.mxu1 %v5429_v32  ;;  %v5489_v26 = vld [vmem:[#allocation5 + $0x34c] ss:$16 sps:$4 sm:$0xff]   ;;  %v5484_v28 = vld [vmem:[#allocation5 + $0x148] ss:$16 sps:$4 sm:$0xff]  }
 0x14c   :  { %v5487_v29 = vld [vmem:[#allocation5 + $0x348] ss:$16 sps:$4 sm:$0xff]   ;;  %v5492_v30 = vld [vmem:[#allocation5 + $0x12c] ss:$16 sps:$4 sm:$0xff]  }
 0x14d   :  { %3576 = vmatpush1.bf16.msra.mxu0 %v5424_v33  ;;  %v5495_v31 = vld [vmem:[#allocation5 + $0x32c] ss:$16 sps:$4 sm:$0xff]   ;;  %v5490_v32 = vld [vmem:[#allocation5 + $0x128] ss:$16 sps:$4 sm:$0xff]  }
 0x14e   :  { %3617 = vmatpush1.bf16.msra.mxu1 %v5427_v47  ;;  %3577 = vmatprep.subr.bf16.mxu0 %v5432_v51  ;;  %v5493_v33 = vld [vmem:[#allocation5 + $0x328] ss:$16 sps:$4 sm:$0xff]   ;;  %v5498_v47 = vld [vmem:[#allocation5 + $0x10c] ss:$16 sps:$4 sm:$0xff]  }
 0x14f   :  { %3618 = vmatprep.subr.bf16.mxu1 %v5435_v34  ;;  %v5501_v51 = vld [vmem:[#allocation5 + $0x30c] ss:$16 sps:$4 sm:$0xff]   ;;  %v5496_v34 = vld [vmem:[#allocation5 + $0x108] ss:$16 sps:$4 sm:$0xff]  }
 0x151   :  { %3578 = vmatpush1.bf16.msra.mxu0 %v5430_v41  ;;  %v5499_v41 = vld [vmem:[#allocation5 + $0x308] ss:$16 sps:$4 sm:$0xff]  }
 0x152   :  { %3619 = vmatpush1.bf16.msra.mxu1 %v5433_v42  ;;  %3579 = vmatprep.subr.bf16.mxu0 %v5438_v43  ;;  %v5504_v42 = vld [vmem:[#allocation5 + $0x4ec] ss:$16 sps:$4 sm:$0xff]  }
 0x153   :  { %3620 = vmatprep.subr.bf16.mxu1 %v5441_v23  ;;  %v5507_v43 = vld [vmem:[#allocation5 + $0x6ec] ss:$16 sps:$4 sm:$0xff]   ;;  %v5502_v23 = vld [vmem:[#allocation5 + $0x4e8] ss:$16 sps:$4 sm:$0xff]  }
 0x155   :  { %3580 = vmatpush1.bf16.msra.mxu0 %v5436_v45  ;;  %v5505_v45 = vld [vmem:[#allocation5 + $0x6e8] ss:$16 sps:$4 sm:$0xff]  }
 0x156   :  { %3621 = vmatpush1.bf16.msra.mxu1 %v5439_v46  ;;  %3581 = vmatprep.subr.bf16.mxu0 %v5444_v48  ;;  %v5510_v46 = vld [vmem:[#allocation5 + $0x4cc] ss:$16 sps:$4 sm:$0xff]  }
 0x157   :  { %3622 = vmatprep.subr.bf16.mxu1 %v5447_v49  ;;  %v5513_v48 = vld [vmem:[#allocation5 + $0x6cc] ss:$16 sps:$4 sm:$0xff]   ;;  %v5508_v49 = vld [vmem:[#allocation5 + $0x4c8] ss:$16 sps:$4 sm:$0xff]  }
 0x159   :  { %3582 = vmatpush1.bf16.msra.mxu0 %v5442_v50  ;;  %v5511_v50 = vld [vmem:[#allocation5 + $0x6c8] ss:$16 sps:$4 sm:$0xff]  }
 0x15a   :  { %3623 = vmatpush1.bf16.msra.mxu1 %v5445_v52  ;;  %3583 = vmatprep.subr.bf16.mxu0 %v5450_v54 }
 0x15b   :  { %3624 = vmatprep.subr.bf16.mxu1 %v5453_v55 }
 0x15d   :  { %3584 = vmatpush1.bf16.msra.mxu0 %v5448_v56 }
 0x15e   :  { %3625 = vmatpush1.bf16.msra.mxu1 %v5451_v57  ;;  %3585 = vmatprep.subr.bf16.mxu0 %v5456_v58  ;;  %v5516_v58 = vld [vmem:[#allocation5 + $0x4ac] ss:$16 sps:$4 sm:$0xff]  }
 0x15f   :  { %3626 = vmatprep.subr.bf16.mxu1 %v5459_v60  ;;  %v5519_v60 = vld [vmem:[#allocation5 + $0x6ac] ss:$16 sps:$4 sm:$0xff]  }
 0x161   :  { %3586 = vmatpush2.bf16.msra.mxu0 %v5454_v61 }
 0x162   :  { %3627 = vmatpush2.bf16.msra.mxu1 %v5457_v1  ;;  %3587 = vmatprep.subr.bf16.mxu0 %v5462_v2  ;;  %v5514_v2 = vld [vmem:[#allocation5 + $0x4a8] ss:$16 sps:$4 sm:$0xff]  }
 0x163   :  { %3628 = vmatprep.subr.bf16.mxu1 %v5465_v3  ;;  %v5517_v3 = vld [vmem:[#allocation5 + $0x6a8] ss:$16 sps:$4 sm:$0xff]  }
 0x165   :  { %3588 = vmatpush2.bf16.msra.mxu0 %v5460_v4 }
 0x166   :  { %3629 = vmatpush2.bf16.msra.mxu1 %v5463_v5  ;;  %3589 = vmatprep.subr.bf16.mxu0 %v5468_v8  ;;  %v5522_v8 = vld [vmem:[#allocation5 + $0x48c] ss:$16 sps:$4 sm:$0xff]  }
 0x167   :  { %3630 = vmatprep.subr.bf16.mxu1 %v5471_v35  ;;  %v5525_v35 = vld [vmem:[#allocation5 + $0x68c] ss:$16 sps:$4 sm:$0xff]  }
 0x169   :  { %3590 = vmatpush2.bf16.msra.mxu0 %v5466_v9  ;;  %v5523_v9 = vld [vmem:[#allocation5 + $0x688] ss:$16 sps:$4 sm:$0xff]  }
 0x16a   :  { %3631 = vmatpush2.bf16.msra.mxu1 %v5469_v40  ;;  %3591 = vmatprep.subr.bf16.mxu0 %v5474_v10  ;;  %v5526_v40 = vld [vmem:[#allocation5 + $0x468] ss:$16 sps:$4 sm:$0xff]  }
 0x16b   :  { %3632 = vmatprep.subr.bf16.mxu1 %v5477_v11  ;;  %v5529_v10 = vld [vmem:[#allocation5 + $0x668] ss:$16 sps:$4 sm:$0xff]   ;;  %v5534_v11 = vld [vmem:[#allocation5 + $0x44c] ss:$16 sps:$4 sm:$0xff]  }
 0x16d   :  { %3592 = vmatpush2.bf16.msra.mxu0 %v5472_v12  ;;  %v5537_v12 = vld [vmem:[#allocation5 + $0x64c] ss:$16 sps:$4 sm:$0xff]  }
 0x16e   :  { %3633 = vmatpush2.bf16.msra.mxu1 %v5475_v13  ;;  %3593 = vmatprep.subr.bf16.mxu0 %v5480_v14  ;;  %v5532_v13 = vld [vmem:[#allocation5 + $0x448] ss:$16 sps:$4 sm:$0xff]  }
 0x16f   :  { %3634 = vmatprep.subr.bf16.mxu1 %v5483_v15  ;;  %v5535_v14 = vld [vmem:[#allocation5 + $0x648] ss:$16 sps:$4 sm:$0xff]   ;;  %v5540_v15 = vld [vmem:[#allocation5 + $0x42c] ss:$16 sps:$4 sm:$0xff]  }
 0x171   :  { %3594 = vmatpush2.bf16.msra.mxu0 %v5478_v19  ;;  %v5543_v19 = vld [vmem:[#allocation5 + $0x62c] ss:$16 sps:$4 sm:$0xff]  }
 0x172   :  { %3635 = vmatpush2.bf16.msra.mxu1 %v5481_v20  ;;  %3595 = vmatprep.subr.bf16.mxu0 %v5486_v21  ;;  %v5538_v20 = vld [vmem:[#allocation5 + $0x428] ss:$16 sps:$4 sm:$0xff]  }
 0x173   :  { %3636 = vmatprep.subr.bf16.mxu1 %v5489_v26  ;;  %v5541_v21 = vld [vmem:[#allocation5 + $0x628] ss:$16 sps:$4 sm:$0xff]   ;;  %v5546_v26 = vld [vmem:[#allocation5 + $0x40c] ss:$16 sps:$4 sm:$0xff]  }
 0x175   :  { %3596 = vmatpush2.bf16.msra.mxu0 %v5484_v28  ;;  %v5549_v28 = vld [vmem:[#allocation5 + $0x60c] ss:$16 sps:$4 sm:$0xff]  }
 0x176   :  { %3637 = vmatpush2.bf16.msra.mxu1 %v5487_v29  ;;  %3597 = vmatprep.subr.bf16.mxu0 %v5492_v30  ;;  %v5544_v29 = vld [vmem:[#allocation5 + $0x408] ss:$16 sps:$4 sm:$0xff]  }
 0x177   :  { %3638 = vmatprep.subr.bf16.mxu1 %v5495_v31  ;;  %v5547_v30 = vld [vmem:[#allocation5 + $0x608] ss:$16 sps:$4 sm:$0xff]   ;;  %v5552_v31 = vld [vmem:[#allocation5 + $0x5ec] ss:$16 sps:$4 sm:$0xff]  }
 0x179   :  { %3598 = vmatpush2.bf16.msra.mxu0 %v5490_v32  ;;  %v5555_v32 = vld [vmem:[#allocation5 + $0x7ec] ss:$16 sps:$4 sm:$0xff]  }
 0x17a   :  { %3639 = vmatpush2.bf16.msra.mxu1 %v5493_v33  ;;  %3599 = vmatprep.subr.bf16.mxu0 %v5498_v47  ;;  %v5550_v33 = vld [vmem:[#allocation5 + $0x5e8] ss:$16 sps:$4 sm:$0xff]  }
 0x17b   :  { %3640 = vmatprep.subr.bf16.mxu1 %v5501_v51  ;;  %v5553_v47 = vld [vmem:[#allocation5 + $0x7e8] ss:$16 sps:$4 sm:$0xff]   ;;  %v5558_v51 = vld [vmem:[#allocation5 + $0x5cc] ss:$16 sps:$4 sm:$0xff]  }
 0x17d   :  { %3600 = vmatpush2.bf16.msra.mxu0 %v5496_v34  ;;  %v5561_v34 = vld [vmem:[#allocation5 + $0x7cc] ss:$16 sps:$4 sm:$0xff]  }
 0x17e   :  { %3641 = vmatpush2.bf16.msra.mxu1 %v5499_v41  ;;  %3651 = vmatprep.subr.bf16.mxu0 %v5504_v42  ;;  %v5556_v41 = vld [vmem:[#allocation5 + $0x5c8] ss:$16 sps:$4 sm:$0xff]  }
 0x17f   :  { %3692 = vmatprep.subr.bf16.mxu1 %v5507_v43  ;;  %v5559_v42 = vld [vmem:[#allocation5 + $0x7c8] ss:$16 sps:$4 sm:$0xff]   ;;  %v5564_v43 = vld [vmem:[#allocation5 + $0x5ac] ss:$16 sps:$4 sm:$0xff]  }
 0x180   :  { %v3357_v52 = vpop.f32.mrf.mxu0  ;;  %3602 = vmatmul.mubr.bf16.vlgmr.msra.gmra.mxu0 %v6076_v6 }
 0x181   :  { %v3398_v54 = vpop.f32.mrf.mxu1  ;;  %3643 = vmatmul.mubr.bf16.vlgmr.msra.gmra.mxu1 %v6078_v7  ;;  %v3358_v55 = vadd.f32 %v3357_v52, %v6162_v18  ;;  %3652 = vmatpush1.bf16.msra.mxu0 %v5502_v23  ;;  %v5567_v23 = vld [vmem:[#allocation5 + $0x7ac] ss:$16 sps:$4 sm:$0xff]   ;;  %v5571_v52 = vld [vmem:[#allocation5 + $0x788] ss:$16 sps:$4 sm:$0xff]  }
 0x182   :  { %3693 = vmatpush1.bf16.msra.mxu1 %v5505_v45  ;;  %v3359_v56 = vpop.f32.mrf.mxu0  ;;  %3653 = vmatprep.subr.bf16.mxu0 %v5510_v46  ;;  %v5562_v45 = vld [vmem:[#allocation5 + $0x5a8] ss:$16 sps:$4 sm:$0xff]  }
 0x183   :  { %v3400_v57 = vpop.f32.mrf.mxu1  ;;  %3694 = vmatprep.subr.bf16.mxu1 %v5513_v48  ;;  %v6171_v61 = vadd.f32 %v3398_v54, %v3358_v55  ;;  %v3360_v1 = vadd.f32 %v3359_v56, %v6166_v27  ;;  %3683 = vmatprep.mubr.bf16.mxu0 %v6088_v36  ;;  %v5520_v27 = vld [vmem:[#allocation5 + $0x488] ss:$16 sps:$4 sm:$0xff]   ;;  %v5528_v36 = vld [vmem:[#allocation5 + $0x46c] ss:$16 sps:$4 sm:$0xff]  }
 0x184   :  { %3724 = vmatprep.mubr.bf16.mxu1 %v6092_v37  ;;  %v3361_v6 = vpop.f32.mrf.mxu0  ;;  %v5531_v37 = vld [vmem:[#allocation5 + $0x66c] ss:$16 sps:$4 sm:$0xff]   ;;  %v5565_v46 = vld [vmem:[#allocation5 + $0x7a8] ss:$16 sps:$4 sm:$0xff]  }
 0x185   :  { %v3402_v7 = vpop.f32.mrf.mxu1  ;;  %v6176_v18 = vadd.f32 %v3400_v57, %v3360_v1  ;;  %3654 = vmatpush1.bf16.msra.mxu0 %v5508_v49  ;;  %v5570_v48 = vld [vmem:[#allocation5 + $0x58c] ss:$16 sps:$4 sm:$0xff]   ;;  %v5574_v56 = vld [vmem:[#allocation5 + $0x568] ss:$16 sps:$4 sm:$0xff]  }
 0x186   :  { %3695 = vmatpush1.bf16.msra.mxu1 %v5511_v50  ;;  %v3362_v4 = vpop.f32.mrf.mxu0  ;;  %3655 = vmatprep.subr.bf16.mxu0 %v5516_v58  ;;  %v5573_v49 = vld [vmem:[#allocation5 + $0x78c] ss:$16 sps:$4 sm:$0xff]   ;;  %v5568_v50 = vld [vmem:[#allocation5 + $0x588] ss:$16 sps:$4 sm:$0xff]  }
 0x187   :  { %v3403_v5 = vpop.f32.mrf.mxu1  ;;  %3696 = vmatprep.subr.bf16.mxu1 %v5519_v60  ;;  %v5576_v54 = vld [vmem:[#allocation5 + $0x56c] ss:$16 sps:$4 sm:$0xff]   ;;  %v5577_v57 = vld [vmem:[#allocation5 + $0x768] ss:$16 sps:$4 sm:$0xff]  }
 0x188   :  { %v5579_v55 = vld [vmem:[#allocation5 + $0x76c] ss:$16 sps:$4 sm:$0xff]   ;;  %v5580_v1 = vld [vmem:[#allocation5 + $0x548] ss:$16 sps:$4 sm:$0xff]  }
 0x189   :  { %3656 = vmatpush1.bf16.msra.mxu0 %v5514_v2  ;;  %v5582_v58 = vld [vmem:[#allocation5 + $0x54c] ss:$16 sps:$4 sm:$0xff]   ;;  %v5583_v2 = vld [vmem:[#allocation5 + $0x748] ss:$16 sps:$4 sm:$0xff]  }
 0x18a   :  { %3697 = vmatpush1.bf16.msra.mxu1 %v5517_v3  ;;  %3657 = vmatprep.subr.bf16.mxu0 %v5522_v8  ;;  %v5585_v60 = vld [vmem:[#allocation5 + $0x74c] ss:$16 sps:$4 sm:$0xff]   ;;  %v5586_v7 = vld [vmem:[#allocation5 + $0x528] ss:$16 sps:$4 sm:$0xff]  }
 0x18b   :  { %3698 = vmatprep.subr.bf16.mxu1 %v5525_v35  ;;  %v5588_v3 = vld [vmem:[#allocation5 + $0x52c] ss:$16 sps:$4 sm:$0xff]   ;;  %v5589_v4 = vld [vmem:[#allocation5 + $0x728] ss:$16 sps:$4 sm:$0xff]  }
 0x18c   :  { %v5591_v6 = vld [vmem:[#allocation5 + $0x72c] ss:$16 sps:$4 sm:$0xff]   ;;  %v5592_v35 = vld [vmem:[#allocation5 + $0x508] ss:$16 sps:$4 sm:$0xff]  }
 0x18d   :  { %3658 = vmatpush1.bf16.msra.mxu0 %v5520_v27  ;;  %v5594_v5 = vld [vmem:[#allocation5 + $0x50c] ss:$16 sps:$4 sm:$0xff]   ;;  %v5595_v27 = vld [vmem:[#allocation5 + $0x708] ss:$16 sps:$4 sm:$0xff]  }
 0x18e   :  { %3699 = vmatpush1.bf16.msra.mxu1 %v5523_v9  ;;  %3659 = vmatprep.subr.bf16.mxu0 %v5528_v36  ;;  %v5597_v8 = vld [vmem:[#allocation5 + $0x70c] ss:$16 sps:$4 sm:$0xff]  }
 0x18f   :  { %3700 = vmatprep.subr.bf16.mxu1 %v5531_v37  ;;  %v5600_v9 = vld [vmem:[#allocation5 + $0x8ec] ss:$16 sps:$4 sm:$0xff]   ;;  %v5598_v37 = vld [vmem:[#allocation5 + $0x8e8] ss:$16 sps:$4 sm:$0xff]  }
 0x190   :  { %v5603_v36 = vld [vmem:[#allocation5 + $0xaec] ss:$16 sps:$4 sm:$0xff]  }
 0x191   :  { %3660 = vmatpush1.bf16.msra.mxu0 %v5526_v40  ;;  %v5601_v40 = vld [vmem:[#allocation5 + $0xae8] ss:$16 sps:$4 sm:$0xff]  }
 0x192   :  { %3701 = vmatpush1.bf16.msra.mxu1 %v5529_v10  ;;  %3661 = vmatprep.subr.bf16.mxu0 %v5534_v11  ;;  %v5606_v10 = vld [vmem:[#allocation5 + $0x8cc] ss:$16 sps:$4 sm:$0xff]  }
 0x193   :  { %3702 = vmatprep.subr.bf16.mxu1 %v5537_v12  ;;  %v5609_v11 = vld [vmem:[#allocation5 + $0xacc] ss:$16 sps:$4 sm:$0xff]  }
 0x195   :  { %3662 = vmatpush1.bf16.msra.mxu0 %v5532_v13 }
 0x196   :  { %3703 = vmatpush1.bf16.msra.mxu1 %v5535_v14  ;;  %3663 = vmatprep.subr.bf16.mxu0 %v5540_v15  ;;  %v5604_v15 = vld [vmem:[#allocation5 + $0x8c8] ss:$16 sps:$4 sm:$0xff]  }
 0x197   :  { %3704 = vmatprep.subr.bf16.mxu1 %v5543_v19  ;;  %v5607_v19 = vld [vmem:[#allocation5 + $0xac8] ss:$16 sps:$4 sm:$0xff]  }
 0x199   :  { %3664 = vmatpush1.bf16.msra.mxu0 %v5538_v20 }
 0x19a   :  { %3705 = vmatpush1.bf16.msra.mxu1 %v5541_v21  ;;  %3665 = vmatprep.subr.bf16.mxu0 %v5546_v26  ;;  %v5612_v26 = vld [vmem:[#allocation5 + $0x8ac] ss:$16 sps:$4 sm:$0xff]  }
 0x19b   :  { %3706 = vmatprep.subr.bf16.mxu1 %v5549_v28  ;;  %v5615_v28 = vld [vmem:[#allocation5 + $0xaac] ss:$16 sps:$4 sm:$0xff]  }
 0x19d   :  { %3666 = vmatpush1.bf16.msra.mxu0 %v5544_v29 }
 0x19e   :  { %3707 = vmatpush1.bf16.msra.mxu1 %v5547_v30  ;;  %3667 = vmatprep.subr.bf16.mxu0 %v5552_v31  ;;  %v5610_v31 = vld [vmem:[#allocation5 + $0x8a8] ss:$16 sps:$4 sm:$0xff]  }
 0x19f   :  { %3708 = vmatprep.subr.bf16.mxu1 %v5555_v32  ;;  %v5613_v32 = vld [vmem:[#allocation5 + $0xaa8] ss:$16 sps:$4 sm:$0xff]  }
 0x1a1   :  { %3668 = vmatpush2.bf16.msra.mxu0 %v5550_v33 }
 0x1a2   :  { %3709 = vmatpush2.bf16.msra.mxu1 %v5553_v47  ;;  %3669 = vmatprep.subr.bf16.mxu0 %v5558_v51  ;;  %v5618_v51 = vld [vmem:[#allocation5 + $0x88c] ss:$16 sps:$4 sm:$0xff]  }
 0x1a3   :  { %3710 = vmatprep.subr.bf16.mxu1 %v5561_v34  ;;  %v5621_v34 = vld [vmem:[#allocation5 + $0xa8c] ss:$16 sps:$4 sm:$0xff]  }
 0x1a5   :  { %3670 = vmatpush2.bf16.msra.mxu0 %v5556_v41  ;;  %v5627_v41 = vld [vmem:[#allocation5 + $0xa6c] ss:$16 sps:$4 sm:$0xff]  }
 0x1a6   :  { %3711 = vmatpush2.bf16.msra.mxu1 %v5559_v42  ;;  %3671 = vmatprep.subr.bf16.mxu0 %v5564_v43  ;;  %v5622_v42 = vld [vmem:[#allocation5 + $0x868] ss:$16 sps:$4 sm:$0xff]  }
 0x1a7   :  { %3712 = vmatprep.subr.bf16.mxu1 %v5567_v23  ;;  %v5625_v43 = vld [vmem:[#allocation5 + $0xa68] ss:$16 sps:$4 sm:$0xff]   ;;  %v5630_v23 = vld [vmem:[#allocation5 + $0x84c] ss:$16 sps:$4 sm:$0xff]  }
 0x1a9   :  { %3672 = vmatpush2.bf16.msra.mxu0 %v5562_v45  ;;  %v5633_v45 = vld [vmem:[#allocation5 + $0xa4c] ss:$16 sps:$4 sm:$0xff]  }
 0x1aa   :  { %3713 = vmatpush2.bf16.msra.mxu1 %v5565_v46  ;;  %3673 = vmatprep.subr.bf16.mxu0 %v5570_v48  ;;  %v5628_v46 = vld [vmem:[#allocation5 + $0x848] ss:$16 sps:$4 sm:$0xff]  }
 0x1ab   :  { %3714 = vmatprep.subr.bf16.mxu1 %v5573_v49  ;;  %v5631_v48 = vld [vmem:[#allocation5 + $0xa48] ss:$16 sps:$4 sm:$0xff]   ;;  %v5636_v49 = vld [vmem:[#allocation5 + $0x82c] ss:$16 sps:$4 sm:$0xff]  }
 0x1ad   :  { %3674 = vmatpush2.bf16.msra.mxu0 %v5568_v50  ;;  %v5639_v50 = vld [vmem:[#allocation5 + $0xa2c] ss:$16 sps:$4 sm:$0xff]  }
 0x1ae   :  { %3715 = vmatpush2.bf16.msra.mxu1 %v5571_v52  ;;  %3675 = vmatprep.subr.bf16.mxu0 %v5576_v54  ;;  %v5634_v52 = vld [vmem:[#allocation5 + $0x828] ss:$16 sps:$4 sm:$0xff]  }
 0x1af   :  { %3716 = vmatprep.subr.bf16.mxu1 %v5579_v55  ;;  %v5637_v54 = vld [vmem:[#allocation5 + $0xa28] ss:$16 sps:$4 sm:$0xff]   ;;  %v5642_v55 = vld [vmem:[#allocation5 + $0x80c] ss:$16 sps:$4 sm:$0xff]  }
 0x1b1   :  { %3676 = vmatpush2.bf16.msra.mxu0 %v5574_v56  ;;  %v5645_v56 = vld [vmem:[#allocation5 + $0xa0c] ss:$16 sps:$4 sm:$0xff]  }
 0x1b2   :  { %3717 = vmatpush2.bf16.msra.mxu1 %v5577_v57  ;;  %3677 = vmatprep.subr.bf16.mxu0 %v5582_v58  ;;  %v5640_v57 = vld [vmem:[#allocation5 + $0x808] ss:$16 sps:$4 sm:$0xff]  }
 0x1b3   :  { %3718 = vmatprep.subr.bf16.mxu1 %v5585_v60  ;;  %v5643_v58 = vld [vmem:[#allocation5 + $0xa08] ss:$16 sps:$4 sm:$0xff]   ;;  %v5648_v60 = vld [vmem:[#allocation5 + $0x9ec] ss:$16 sps:$4 sm:$0xff]  }
 0x1b5   :  { %3678 = vmatpush2.bf16.msra.mxu0 %v5580_v1  ;;  %v5651_v1 = vld [vmem:[#allocation5 + $0xbec] ss:$16 sps:$4 sm:$0xff]  }
 0x1b6   :  { %3719 = vmatpush2.bf16.msra.mxu1 %v5583_v2  ;;  %3679 = vmatprep.subr.bf16.mxu0 %v5588_v3  ;;  %v5646_v2 = vld [vmem:[#allocation5 + $0x9e8] ss:$16 sps:$4 sm:$0xff]  }
 0x1b7   :  { %3720 = vmatprep.subr.bf16.mxu1 %v5591_v6  ;;  %v5649_v3 = vld [vmem:[#allocation5 + $0xbe8] ss:$16 sps:$4 sm:$0xff]   ;;  %v5654_v6 = vld [vmem:[#allocation5 + $0x9cc] ss:$16 sps:$4 sm:$0xff]  }
 0x1b9   :  { %3680 = vmatpush2.bf16.msra.mxu0 %v5586_v7  ;;  %v5657_v7 = vld [vmem:[#allocation5 + $0xbcc] ss:$16 sps:$4 sm:$0xff]  }
 0x1ba   :  { %3721 = vmatpush2.bf16.msra.mxu1 %v5589_v4  ;;  %3681 = vmatprep.subr.bf16.mxu0 %v5594_v5  ;;  %v5652_v4 = vld [vmem:[#allocation5 + $0x9c8] ss:$16 sps:$4 sm:$0xff]  }
 0x1bb   :  { %3722 = vmatprep.subr.bf16.mxu1 %v5597_v8  ;;  %v5655_v5 = vld [vmem:[#allocation5 + $0xbc8] ss:$16 sps:$4 sm:$0xff]   ;;  %v5660_v8 = vld [vmem:[#allocation5 + $0x9ac] ss:$16 sps:$4 sm:$0xff]  }
 0x1bd   :  { %3682 = vmatpush2.bf16.msra.mxu0 %v5592_v35  ;;  %v5663_v35 = vld [vmem:[#allocation5 + $0xbac] ss:$16 sps:$4 sm:$0xff]  }
 0x1be   :  { %3723 = vmatpush2.bf16.msra.mxu1 %v5595_v27  ;;  %3733 = vmatprep.subr.bf16.mxu0 %v5600_v9  ;;  %v5658_v27 = vld [vmem:[#allocation5 + $0x9a8] ss:$16 sps:$4 sm:$0xff]  }
 0x1bf   :  { %3774 = vmatprep.subr.bf16.mxu1 %v5603_v36  ;;  %v5661_v9 = vld [vmem:[#allocation5 + $0xba8] ss:$16 sps:$4 sm:$0xff]   ;;  %v5666_v36 = vld [vmem:[#allocation5 + $0x98c] ss:$16 sps:$4 sm:$0xff]  }
 0x1c0   :  { %v3439_v12 = vpop.f32.mrf.mxu0  ;;  %3684 = vmatmul.mubr.bf16.vlgmr.msra.gmra.mxu0 %v6098_v16 }
 0x1c1   :  { %v3480_v13 = vpop.f32.mrf.mxu1  ;;  %3725 = vmatmul.mubr.bf16.vlgmr.msra.gmra.mxu1 %v6102_v17  ;;  %v3440_v14 = vadd.f32 %v3439_v12, %v6171_v61  ;;  %3734 = vmatpush1.bf16.msra.mxu0 %v5598_v37  ;;  %v5669_v37 = vld [vmem:[#allocation5 + $0xb8c] ss:$16 sps:$4 sm:$0xff]  }
 0x1c2   :  { %3775 = vmatpush1.bf16.msra.mxu1 %v5601_v40  ;;  %v3441_v20 = vpop.f32.mrf.mxu0  ;;  %3735 = vmatprep.subr.bf16.mxu0 %v5606_v10  ;;  %v5664_v40 = vld [vmem:[#allocation5 + $0x988] ss:$16 sps:$4 sm:$0xff]   ;;  %v5675_v12 = vld [vmem:[#allocation5 + $0xb6c] ss:$16 sps:$4 sm:$0xff]  }
 0x1c3   :  { %v3482_v21 = vpop.f32.mrf.mxu1  ;;  %3776 = vmatprep.subr.bf16.mxu1 %v5609_v11  ;;  %v6181_v29 = vadd.f32 %v3480_v13, %v3440_v14  ;;  %v3442_v30 = vadd.f32 %v3441_v20, %v6176_v18  ;;  %3765 = vmatprep.mubr.bf16.mxu0 %v6110_v24  ;;  %v5616_v18 = vld [vmem:[#allocation5 + $0x888] ss:$16 sps:$4 sm:$0xff]   ;;  %v5672_v11 = vld [vmem:[#allocation5 + $0x96c] ss:$16 sps:$4 sm:$0xff]  }
 0x1c4   :  { %3806 = vmatprep.mubr.bf16.mxu1 %v6114_v25  ;;  %v3443_v16 = vpop.f32.mrf.mxu0  ;;  %v5619_v24 = vld [vmem:[#allocation5 + $0xa88] ss:$16 sps:$4 sm:$0xff]   ;;  %v5624_v25 = vld [vmem:[#allocation5 + $0x86c] ss:$16 sps:$4 sm:$0xff]  }
 0x1c5   :  { %v3484_v17 = vpop.f32.mrf.mxu1  ;;  %v6186_v61 = vadd.f32 %v3482_v21, %v3442_v30  ;;  %3736 = vmatpush1.bf16.msra.mxu0 %v5604_v15  ;;  %v5667_v10 = vld [vmem:[#allocation5 + $0xb88] ss:$16 sps:$4 sm:$0xff]   ;;  %v5678_v15 = vld [vmem:[#allocation5 + $0x94c] ss:$16 sps:$4 sm:$0xff]  }
 0x1c6   :  { %3777 = vmatpush1.bf16.msra.mxu1 %v5607_v19  ;;  %v3444_v33 = vpop.f32.mrf.mxu0  ;;  %3737 = vmatprep.subr.bf16.mxu0 %v5612_v26  ;;  %v5670_v13 = vld [vmem:[#allocation5 + $0x968] ss:$16 sps:$4 sm:$0xff]   ;;  %v5681_v19 = vld [vmem:[#allocation5 + $0xb4c] ss:$16 sps:$4 sm:$0xff]  }
 0x1c7   :  { %v3485_v47 = vpop.f32.mrf.mxu1  ;;  %3778 = vmatprep.subr.bf16.mxu1 %v5615_v28  ;;  %v5673_v14 = vld [vmem:[#allocation5 + $0xb68] ss:$16 sps:$4 sm:$0xff]   ;;  %v5684_v26 = vld [vmem:[#allocation5 + $0x92c] ss:$16 sps:$4 sm:$0xff]  }
 0x1c8   :  { %v5676_v20 = vld [vmem:[#allocation5 + $0x948] ss:$16 sps:$4 sm:$0xff]   ;;  %v5687_v28 = vld [vmem:[#allocation5 + $0xb2c] ss:$16 sps:$4 sm:$0xff]  }
 0x1c9   :  { %3738 = vmatpush1.bf16.msra.mxu0 %v5610_v31  ;;  %v5679_v21 = vld [vmem:[#allocation5 + $0xb48] ss:$16 sps:$4 sm:$0xff]   ;;  %v5690_v17 = vld [vmem:[#allocation5 + $0x90c] ss:$16 sps:$4 sm:$0xff]  }
 0x1ca   :  { %3779 = vmatpush1.bf16.msra.mxu1 %v5613_v32  ;;  %3739 = vmatprep.subr.bf16.mxu0 %v5618_v51  ;;  %v5682_v30 = vld [vmem:[#allocation5 + $0x928] ss:$16 sps:$4 sm:$0xff]   ;;  %v5693_v31 = vld [vmem:[#allocation5 + $0xb0c] ss:$16 sps:$4 sm:$0xff]  }
 0x1cb   :  { %3780 = vmatprep.subr.bf16.mxu1 %v5621_v34  ;;  %v5685_v16 = vld [vmem:[#allocation5 + $0xb28] ss:$16 sps:$4 sm:$0xff]   ;;  %v5696_v47 = vld [vmem:[#allocation5 + $0xcec] ss:$16 sps:$4 sm:$0xff]  }
 0x1cc   :  { %v5688_v32 = vld [vmem:[#allocation5 + $0x908] ss:$16 sps:$4 sm:$0xff]   ;;  %v5699_v51 = vld [vmem:[#allocation5 + $0xeec] ss:$16 sps:$4 sm:$0xff]  }
 0x1cd   :  { %3740 = vmatpush1.bf16.msra.mxu0 %v5616_v18  ;;  %v5691_v33 = vld [vmem:[#allocation5 + $0xb08] ss:$16 sps:$4 sm:$0xff]  }
 0x1ce   :  { %3781 = vmatpush1.bf16.msra.mxu1 %v5619_v24  ;;  %3741 = vmatprep.subr.bf16.mxu0 %v5624_v25  ;;  %v5694_v34 = vld [vmem:[#allocation5 + $0xce8] ss:$16 sps:$4 sm:$0xff]   ;;  %v5702_v24 = vld [vmem:[#allocation5 + $0xccc] ss:$16 sps:$4 sm:$0xff]  }
 0x1cf   :  { %3782 = vmatprep.subr.bf16.mxu1 %v5627_v41  ;;  %v5697_v18 = vld [vmem:[#allocation5 + $0xee8] ss:$16 sps:$4 sm:$0xff]   ;;  %v5705_v25 = vld [vmem:[#allocation5 + $0xecc] ss:$16 sps:$4 sm:$0xff]  }
 0x1d1   :  { %3742 = vmatpush1.bf16.msra.mxu0 %v5622_v42 }
 0x1d2   :  { %3783 = vmatpush1.bf16.msra.mxu1 %v5625_v43  ;;  %3743 = vmatprep.subr.bf16.mxu0 %v5630_v23  ;;  %v5700_v23 = vld [vmem:[#allocation5 + $0xcc8] ss:$16 sps:$4 sm:$0xff]  }
 0x1d3   :  { %3784 = vmatprep.subr.bf16.mxu1 %v5633_v45  ;;  %v5703_v45 = vld [vmem:[#allocation5 + $0xec8] ss:$16 sps:$4 sm:$0xff]  }
 0x1d5   :  { %3744 = vmatpush1.bf16.msra.mxu0 %v5628_v46 }
 0x1d6   :  { %3785 = vmatpush1.bf16.msra.mxu1 %v5631_v48  ;;  %3745 = vmatprep.subr.bf16.mxu0 %v5636_v49  ;;  %v5708_v49 = vld [vmem:[#allocation5 + $0xcac] ss:$16 sps:$4 sm:$0xff]  }
 0x1d7   :  { %3786 = vmatprep.subr.bf16.mxu1 %v5639_v50  ;;  %v5711_v50 = vld [vmem:[#allocation5 + $0xeac] ss:$16 sps:$4 sm:$0xff]  }
 0x1d9   :  { %3746 = vmatpush1.bf16.msra.mxu0 %v5634_v52 }
 0x1da   :  { %3787 = vmatpush1.bf16.msra.mxu1 %v5637_v54  ;;  %3747 = vmatprep.subr.bf16.mxu0 %v5642_v55  ;;  %v5709_v54 = vld [vmem:[#allocation5 + $0xea8] ss:$16 sps:$4 sm:$0xff]  }
 0x1db   :  { %3788 = vmatprep.subr.bf16.mxu1 %v5645_v56 }
 0x1dd   :  { %3748 = vmatpush1.bf16.msra.mxu0 %v5640_v57  ;;  %v5714_v57 = vld [vmem:[#allocation5 + $0xc8c] ss:$16 sps:$4 sm:$0xff]  }
 0x1de   :  { %3789 = vmatpush1.bf16.msra.mxu1 %v5643_v58  ;;  %3749 = vmatprep.subr.bf16.mxu0 %v5648_v60  ;;  %v5717_v58 = vld [vmem:[#allocation5 + $0xe8c] ss:$16 sps:$4 sm:$0xff]   ;;  %v5712_v60 = vld [vmem:[#allocation5 + $0xc88] ss:$16 sps:$4 sm:$0xff]  }
 0x1df   :  { %3790 = vmatprep.subr.bf16.mxu1 %v5651_v1  ;;  %v5715_v1 = vld [vmem:[#allocation5 + $0xe88] ss:$16 sps:$4 sm:$0xff]  }
 0x1e1   :  { %3750 = vmatpush2.bf16.msra.mxu0 %v5646_v2  ;;  %v5718_v2 = vld [vmem:[#allocation5 + $0xc68] ss:$16 sps:$4 sm:$0xff]  }
 0x1e2   :  { %3791 = vmatpush2.bf16.msra.mxu1 %v5649_v3  ;;  %3751 = vmatprep.subr.bf16.mxu0 %v5654_v6  ;;  %v5721_v3 = vld [vmem:[#allocation5 + $0xe68] ss:$16 sps:$4 sm:$0xff]   ;;  %v5726_v6 = vld [vmem:[#allocation5 + $0xc4c] ss:$16 sps:$4 sm:$0xff]  }
 0x1e3   :  { %3792 = vmatprep.subr.bf16.mxu1 %v5657_v7  ;;  %v5729_v7 = vld [vmem:[#allocation5 + $0xe4c] ss:$16 sps:$4 sm:$0xff]  }
 0x1e5   :  { %3752 = vmatpush2.bf16.msra.mxu0 %v5652_v4  ;;  %v5724_v4 = vld [vmem:[#allocation5 + $0xc48] ss:$16 sps:$4 sm:$0xff]  }
 0x1e6   :  { %3793 = vmatpush2.bf16.msra.mxu1 %v5655_v5  ;;  %3753 = vmatprep.subr.bf16.mxu0 %v5660_v8  ;;  %v5727_v5 = vld [vmem:[#allocation5 + $0xe48] ss:$16 sps:$4 sm:$0xff]   ;;  %v5732_v8 = vld [vmem:[#allocation5 + $0xc2c] ss:$16 sps:$4 sm:$0xff]  }
 0x1e7   :  { %3794 = vmatprep.subr.bf16.mxu1 %v5663_v35  ;;  %v5735_v35 = vld [vmem:[#allocation5 + $0xe2c] ss:$16 sps:$4 sm:$0xff]  }
 0x1e9   :  { %3754 = vmatpush2.bf16.msra.mxu0 %v5658_v27  ;;  %v5730_v27 = vld [vmem:[#allocation5 + $0xc28] ss:$16 sps:$4 sm:$0xff]  }
 0x1ea   :  { %3795 = vmatpush2.bf16.msra.mxu1 %v5661_v9  ;;  %3755 = vmatprep.subr.bf16.mxu0 %v5666_v36  ;;  %v5733_v9 = vld [vmem:[#allocation5 + $0xe28] ss:$16 sps:$4 sm:$0xff]   ;;  %v5738_v36 = vld [vmem:[#allocation5 + $0xc0c] ss:$16 sps:$4 sm:$0xff]  }
 0x1eb   :  { %3796 = vmatprep.subr.bf16.mxu1 %v5669_v37  ;;  %v5741_v37 = vld [vmem:[#allocation5 + $0xe0c] ss:$16 sps:$4 sm:$0xff]  }
 0x1ed   :  { %3756 = vmatpush2.bf16.msra.mxu0 %v5664_v40  ;;  %v5736_v40 = vld [vmem:[#allocation5 + $0xc08] ss:$16 sps:$4 sm:$0xff]  }
 0x1ee   :  { %3797 = vmatpush2.bf16.msra.mxu1 %v5667_v10  ;;  %3757 = vmatprep.subr.bf16.mxu0 %v5672_v11  ;;  %v5739_v10 = vld [vmem:[#allocation5 + $0xe08] ss:$16 sps:$4 sm:$0xff]   ;;  %v5744_v11 = vld [vmem:[#allocation5 + $0xdec] ss:$16 sps:$4 sm:$0xff]  }
 0x1ef   :  { %3798 = vmatprep.subr.bf16.mxu1 %v5675_v12  ;;  %v5747_v12 = vld [vmem:[#allocation5 + $0xfec] ss:$16 sps:$4 sm:$0xff]  }
 0x1f1   :  { %3758 = vmatpush2.bf16.msra.mxu0 %v5670_v13  ;;  %v5742_v13 = vld [vmem:[#allocation5 + $0xde8] ss:$16 sps:$4 sm:$0xff]  }
 0x1f2   :  { %3799 = vmatpush2.bf16.msra.mxu1 %v5673_v14  ;;  %3759 = vmatprep.subr.bf16.mxu0 %v5678_v15  ;;  %v5745_v14 = vld [vmem:[#allocation5 + $0xfe8] ss:$16 sps:$4 sm:$0xff]   ;;  %v5750_v15 = vld [vmem:[#allocation5 + $0xdcc] ss:$16 sps:$4 sm:$0xff]  }
 0x1f3   :  { %3800 = vmatprep.subr.bf16.mxu1 %v5681_v19  ;;  %v5753_v19 = vld [vmem:[#allocation5 + $0xfcc] ss:$16 sps:$4 sm:$0xff]  }
 0x1f5   :  { %3760 = vmatpush2.bf16.msra.mxu0 %v5676_v20  ;;  %v5748_v20 = vld [vmem:[#allocation5 + $0xdc8] ss:$16 sps:$4 sm:$0xff]  }
 0x1f6   :  { %3801 = vmatpush2.bf16.msra.mxu1 %v5679_v21  ;;  %3761 = vmatprep.subr.bf16.mxu0 %v5684_v26  ;;  %v5751_v21 = vld [vmem:[#allocation5 + $0xfc8] ss:$16 sps:$4 sm:$0xff]   ;;  %v5756_v26 = vld [vmem:[#allocation5 + $0xdac] ss:$16 sps:$4 sm:$0xff]  }
 0x1f7   :  { %3802 = vmatprep.subr.bf16.mxu1 %v5687_v28  ;;  %v5759_v28 = vld [vmem:[#allocation5 + $0xfac] ss:$16 sps:$4 sm:$0xff]  }
 0x1f9   :  { %3762 = vmatpush2.bf16.msra.mxu0 %v5682_v30  ;;  %v5754_v30 = vld [vmem:[#allocation5 + $0xda8] ss:$16 sps:$4 sm:$0xff]  }
 0x1fa   :  { %3803 = vmatpush2.bf16.msra.mxu1 %v5685_v16  ;;  %3763 = vmatprep.subr.bf16.mxu0 %v5690_v17  ;;  %v5757_v16 = vld [vmem:[#allocation5 + $0xfa8] ss:$16 sps:$4 sm:$0xff]   ;;  %v5762_v17 = vld [vmem:[#allocation5 + $0xd8c] ss:$16 sps:$4 sm:$0xff]  }
 0x1fb   :  { %3804 = vmatprep.subr.bf16.mxu1 %v5693_v31  ;;  %v5765_v31 = vld [vmem:[#allocation5 + $0xf8c] ss:$16 sps:$4 sm:$0xff]  }
 0x1fd   :  { %3764 = vmatpush2.bf16.msra.mxu0 %v5688_v32  ;;  %v5760_v32 = vld [vmem:[#allocation5 + $0xd88] ss:$16 sps:$4 sm:$0xff]  }
 0x1fe   :  { %3805 = vmatpush2.bf16.msra.mxu1 %v5691_v33  ;;  %3815 = vmatprep.subr.bf16.mxu0 %v5696_v47  ;;  %v5763_v33 = vld [vmem:[#allocation5 + $0xf88] ss:$16 sps:$4 sm:$0xff]   ;;  %v5768_v47 = vld [vmem:[#allocation5 + $0xd6c] ss:$16 sps:$4 sm:$0xff]  }
 0x1ff   :  { %3856 = vmatprep.subr.bf16.mxu1 %v5699_v51  ;;  %v5771_v51 = vld [vmem:[#allocation5 + $0xf6c] ss:$16 sps:$4 sm:$0xff]  }
 0x200   :  { %v3521_v41 = vpop.f32.mrf.mxu0  ;;  %3766 = vmatmul.mubr.bf16.vlgmr.msra.gmra.mxu0 %v6124_v38 }
 0x201   :  { %v3562_v42 = vpop.f32.mrf.mxu1  ;;  %3807 = vmatmul.mubr.bf16.vlgmr.msra.gmra.mxu1 %v6128_v39  ;;  %v3522_v43 = vadd.f32 %v3521_v41, %v6181_v29  ;;  %3816 = vmatpush1.bf16.msra.mxu0 %v5694_v34  ;;  %v5706_v29 = vld [vmem:[#allocation5 + $0xca8] ss:$16 sps:$4 sm:$0xff]  }
 0x202   :  { %3857 = vmatpush1.bf16.msra.mxu1 %v5697_v18  ;;  %v6191_v46 = vpop.f32.mrf.mxu0  ;;  %3817 = vmatprep.subr.bf16.mxu0 %v5702_v24  ;;  %v5766_v34 = vld [vmem:[#allocation5 + $0xd68] ss:$16 sps:$4 sm:$0xff]   ;;  %v5774_v24 = vld [vmem:[#allocation5 + $0xd4c] ss:$16 sps:$4 sm:$0xff]  }
 0x203   :  { %v6193_v48 = vpop.f32.mrf.mxu1  ;;  %3858 = vmatprep.subr.bf16.mxu1 %v5705_v25  ;;  %v6195_v52 = vadd.f32 %v3562_v42, %v3522_v43  ;;  %3847 = vmatprep.mubr.bf16.mxu0 %v6134_v44  ;;  %v5720_v44 = vld [vmem:[#allocation5 + $0xc6c] ss:$16 sps:$4 sm:$0xff]   ;;  %v5769_v18 = vld [vmem:[#allocation5 + $0xf68] ss:$16 sps:$4 sm:$0xff]  }
 0x204   :  { %3888 = vmatprep.mubr.bf16.mxu1 %v6138_v22  ;;  %v3525_v38 = vpop.f32.mrf.mxu0  ;;  %v5723_v22 = vld [vmem:[#allocation5 + $0xe6c] ss:$16 sps:$4 sm:$0xff]   ;;  %v5772_v41 = vld [vmem:[#allocation5 + $0xd48] ss:$16 sps:$4 sm:$0xff]  }
 0x205   :  { %v3566_v39 = vpop.f32.mrf.mxu1  ;;  %3818 = vmatpush1.bf16.msra.mxu0 %v5700_v23  ;;  %v5777_v25 = vld [vmem:[#allocation5 + $0xf4c] ss:$16 sps:$4 sm:$0xff]   ;;  %v5775_v42 = vld [vmem:[#allocation5 + $0xf48] ss:$16 sps:$4 sm:$0xff]  }
 0x206   :  { %3859 = vmatpush1.bf16.msra.mxu1 %v5703_v45  ;;  %v3526_v55 = vpop.f32.mrf.mxu0  ;;  %3819 = vmatprep.subr.bf16.mxu0 %v5708_v49  ;;  %v5780_v43 = vld [vmem:[#allocation5 + $0xd2c] ss:$16 sps:$4 sm:$0xff]   ;;  %v3524_v45 = vadd.f32 %v6191_v46, %v6186_v61  ;;  %v5778_v49 = vld [vmem:[#allocation5 + $0xd28] ss:$16 sps:$4 sm:$0xff]   ;;  %v619_v46 = vsub.s32 3, %v6144_v53 }
 0x207   :  { %v3567_v56 = vpop.f32.mrf.mxu1  ;;  %3860 = vmatprep.subr.bf16.mxu1 %v5711_v50  ;;  %v5783_v23 = vld [vmem:[#allocation5 + $0xf2c] ss:$16 sps:$4 sm:$0xff]   ;;  %v5781_v50 = vld [vmem:[#allocation5 + $0xf28] ss:$16 sps:$4 sm:$0xff]  }
 0x208   :  { %v5786_v38 = vld [vmem:[#allocation5 + $0xd0c] ss:$16 sps:$4 sm:$0xff]   ;;  %v5787_v55 = vld [vmem:[#allocation5 + $0xf08] ss:$16 sps:$4 sm:$0xff]   ;;  %v615_v56 = vsub.s32 2, %v6144_v53 }
 0x209   :  { %3820 = vmatpush1.bf16.msra.mxu0 %v5706_v29  ;;  %v5789_v39 = vld [vmem:[#allocation5 + $0xf0c] ss:$16 sps:$4 sm:$0xff]   ;;  %v3565_v29 = vadd.f32 %v6193_v48, %v3524_v45  ;;  %v5861_v45 = vld [vmem:[#allocation8 + $0x104] ss:$8 sps:$4 sm:$0xff]  }
 0x20a   :  { %3861 = vmatpush1.bf16.msra.mxu1 %v5709_v54  ;;  %3821 = vmatprep.subr.bf16.mxu0 %v5714_v57  ;;  %v5784_v54 = vld [vmem:[#allocation5 + $0xd08] ss:$16 sps:$4 sm:$0xff]  }
 0x20b   :  { %3862 = vmatprep.subr.bf16.mxu1 %v5717_v58  ;;  %v5792_v57 = vld [vmem:[#allocation8 + $0x74] ss:$8 sps:$4 sm:$0xff]   ;;  %v3898_v61 = vmax.f32 %v3565_v29, 0.0  ;;  %v5820_v29 = vld [vmem:[#allocation8 + $0xd0] ss:$8 sps:$4 sm:$0xff]  }
 0x20c   :  { %v5886_v58 = vld [vmem:[#allocation7] sm:$0xf] }
 0x20d   :  { %3822 = vmatpush1.bf16.msra.mxu0 %v5712_v60  ;;  %v616_v60 = vrot.slane %v5886_v58, %v615_v56  ;;  %v3902_v48 = vpack.c.bf16 %v3898_v61, %v3898_v61  ;;  %v5867_v56 = vld [vmem:[#allocation8 + $0x1e4] ss:$8 sps:$4 sm:$0xff]   ;;  %v5865_v61 = vld [vmem:[#allocation8 + $0x1e0] ss:$8 sps:$4 sm:$0xff]  }
 0x20e   :  { %3863 = vmatpush1.bf16.msra.mxu1 %v5715_v1  ;;  %3823 = vmatprep.subr.bf16.mxu0 %v5720_v44  ;;  %v5790_v1 = vld [vmem:[#allocation8 + $0x70] ss:$8 sps:$4 sm:$0xff]   ;;  %v5795_v44 = vld [vmem:[#allocation8 + $0x64] ss:$8 sps:$4 sm:$0xff]  }
 0x20f   :  { %3864 = vmatprep.subr.bf16.mxu1 %v5723_v22  ;;  %v620_v22 = vrot.slane %v5886_v58, %v619_v46  ;;  %v5828_v46 = vld [vmem:[#allocation8 + $0xb4] ss:$8 sps:$4 sm:$0xff]  }
 0x210   :  { %v5870_v58 = vld [vmem:[#allocation8 + $0x1d4] ss:$8 sps:$4 sm:$0xff]  }
 0x211   :  { %3824 = vmatpush1.bf16.msra.mxu0 %v5718_v2 }
 0x212   :  { %3865 = vmatpush1.bf16.msra.mxu1 %v5721_v3  ;;  %3825 = vmatprep.subr.bf16.mxu0 %v5726_v6 }
 0x213   :  { %3866 = vmatprep.subr.bf16.mxu1 %v5729_v7  ;;  %v5793_v7 = vld [vmem:[#allocation8 + $0x60] ss:$8 sps:$4 sm:$0xff]  }
 0x215   :  { %3826 = vmatpush1.bf16.msra.mxu0 %v5724_v4 }
 0x216   :  { %3867 = vmatpush1.bf16.msra.mxu1 %v5727_v5  ;;  %3827 = vmatprep.subr.bf16.mxu0 %v5732_v8  ;;  %v5798_v8 = vld [vmem:[#allocation8 + $0x54] ss:$8 sps:$4 sm:$0xff]  }
 0x217   :  { %3868 = vmatprep.subr.bf16.mxu1 %v5735_v35 }
 0x219   :  { %3828 = vmatpush1.bf16.msra.mxu0 %v5730_v27 }
 0x21a   :  { %3869 = vmatpush1.bf16.msra.mxu1 %v5733_v9  ;;  %3829 = vmatprep.subr.bf16.mxu0 %v5738_v36 }
 0x21b   :  { %3870 = vmatprep.subr.bf16.mxu1 %v5741_v37 }
 0x21d   :  { %3830 = vmatpush1.bf16.msra.mxu0 %v5736_v40  ;;  %v5796_v40 = vld [vmem:[#allocation8 + $0x50] ss:$8 sps:$4 sm:$0xff]  }
 0x21e   :  { %3871 = vmatpush1.bf16.msra.mxu1 %v5739_v10  ;;  %3831 = vmatprep.subr.bf16.mxu0 %v5744_v11  ;;  %v5838_v11 = vld [vmem:[#allocation8 + $0x170] ss:$8 sps:$4 sm:$0xff]  }
 0x21f   :  { %3872 = vmatprep.subr.bf16.mxu1 %v5747_v12  ;;  %v5840_v12 = vld [vmem:[#allocation8 + $0x174] ss:$8 sps:$4 sm:$0xff]  }
 0x221   :  { %3832 = vmatpush2.bf16.msra.mxu0 %v5742_v13  ;;  %v5843_v13 = vld [vmem:[#allocation8 + $0x164] ss:$8 sps:$4 sm:$0xff]  }
 0x222   :  { %3873 = vmatpush2.bf16.msra.mxu1 %v5745_v14  ;;  %3833 = vmatprep.subr.bf16.mxu0 %v5750_v15  ;;  %v5799_v14 = vld [vmem:[#allocation8 + $0x40] ss:$8 sps:$4 sm:$0xff]  }
 0x223   :  { %3874 = vmatprep.subr.bf16.mxu1 %v5753_v19  ;;  %v5841_v15 = vld [vmem:[#allocation8 + $0x160] ss:$8 sps:$4 sm:$0xff]   ;;  %v5804_v19 = vld [vmem:[#allocation8 + $0x34] ss:$8 sps:$4 sm:$0xff]  }
 0x225   :  { %3834 = vmatpush2.bf16.msra.mxu0 %v5748_v20  ;;  %v5846_v20 = vld [vmem:[#allocation8 + $0x154] ss:$8 sps:$4 sm:$0xff]  }
 0x226   :  { %3875 = vmatpush2.bf16.msra.mxu1 %v5751_v21  ;;  %3835 = vmatprep.subr.bf16.mxu0 %v5756_v26  ;;  %v5802_v21 = vld [vmem:[#allocation8 + $0x30] ss:$8 sps:$4 sm:$0xff]  }
 0x227   :  { %3876 = vmatprep.subr.bf16.mxu1 %v5759_v28  ;;  %v5844_v26 = vld [vmem:[#allocation8 + $0x150] ss:$8 sps:$4 sm:$0xff]   ;;  %v5807_v28 = vld [vmem:[#allocation8 + $0x24] ss:$8 sps:$4 sm:$0xff]  }
 0x229   :  { %3836 = vmatpush2.bf16.msra.mxu0 %v5754_v30  ;;  %v5849_v30 = vld [vmem:[#allocation8 + $0x144] ss:$8 sps:$4 sm:$0xff]  }
 0x22a   :  { %3877 = vmatpush2.bf16.msra.mxu1 %v5757_v16  ;;  %3837 = vmatprep.subr.bf16.mxu0 %v5762_v17  ;;  %v5805_v16 = vld [vmem:[#allocation8 + $0x20] ss:$8 sps:$4 sm:$0xff]  }
 0x22b   :  { %3878 = vmatprep.subr.bf16.mxu1 %v5765_v31  ;;  %v5847_v17 = vld [vmem:[#allocation8 + $0x140] ss:$8 sps:$4 sm:$0xff]   ;;  %v5810_v31 = vld [vmem:[#allocation8 + $0x14] ss:$8 sps:$4 sm:$0xff]  }
 0x22d   :  { %3838 = vmatpush2.bf16.msra.mxu0 %v5760_v32  ;;  %v5852_v32 = vld [vmem:[#allocation8 + $0x134] ss:$8 sps:$4 sm:$0xff]  }
 0x22e   :  { %3879 = vmatpush2.bf16.msra.mxu1 %v5763_v33  ;;  %3839 = vmatprep.subr.bf16.mxu0 %v5768_v47  ;;  %v5808_v33 = vld [vmem:[#allocation8 + $0x10] ss:$8 sps:$4 sm:$0xff]  }
 0x22f   :  { %3880 = vmatprep.subr.bf16.mxu1 %v5771_v51  ;;  %v5850_v47 = vld [vmem:[#allocation8 + $0x130] ss:$8 sps:$4 sm:$0xff]   ;;  %v5813_v51 = vld [vmem:[#allocation8 + $0x4] ss:$8 sps:$4 sm:$0xff]  }
 0x231   :  { %3840 = vmatpush2.bf16.msra.mxu0 %v5766_v34  ;;  %v5855_v34 = vld [vmem:[#allocation8 + $0x124] ss:$8 sps:$4 sm:$0xff]  }
 0x232   :  { %3881 = vmatpush2.bf16.msra.mxu1 %v5769_v18  ;;  %3841 = vmatprep.subr.bf16.mxu0 %v5774_v24  ;;  %v5811_v18 = vld [vmem:[#allocation8] ss:$8 sps:$4 sm:$0xff]  }
 0x233   :  { %3882 = vmatprep.subr.bf16.mxu1 %v5777_v25  ;;  %v5853_v24 = vld [vmem:[#allocation8 + $0x120] ss:$8 sps:$4 sm:$0xff]   ;;  %v5816_v25 = vld [vmem:[#allocation8 + $0xf4] ss:$8 sps:$4 sm:$0xff]  }
 0x235   :  { %3842 = vmatpush2.bf16.msra.mxu0 %v5772_v41  ;;  %v5858_v41 = vld [vmem:[#allocation8 + $0x114] ss:$8 sps:$4 sm:$0xff]  }
 0x236   :  { %3883 = vmatpush2.bf16.msra.mxu1 %v5775_v42  ;;  %3843 = vmatprep.subr.bf16.mxu0 %v5780_v43  ;;  %v5814_v42 = vld [vmem:[#allocation8 + $0xf0] ss:$8 sps:$4 sm:$0xff]  }
 0x237   :  { %3884 = vmatprep.subr.bf16.mxu1 %v5783_v23  ;;  %v5856_v43 = vld [vmem:[#allocation8 + $0x110] ss:$8 sps:$4 sm:$0xff]   ;;  %v5819_v23 = vld [vmem:[#allocation8 + $0xe4] ss:$8 sps:$4 sm:$0xff]  }
 0x239   :  { %3844 = vmatpush2.bf16.msra.mxu0 %v5778_v49  ;;  %v5817_v49 = vld [vmem:[#allocation8 + $0xe0] ss:$8 sps:$4 sm:$0xff]  }
 0x23a   :  { %3885 = vmatpush2.bf16.msra.mxu1 %v5781_v50  ;;  %3845 = vmatprep.subr.bf16.mxu0 %v5786_v38  ;;  %v5859_v50 = vld [vmem:[#allocation8 + $0x100] ss:$8 sps:$4 sm:$0xff]   ;;  %v5822_v38 = vld [vmem:[#allocation8 + $0xd4] ss:$8 sps:$4 sm:$0xff]  }
 0x23b   :  { %3886 = vmatprep.subr.bf16.mxu1 %v5789_v39  ;;  %v5864_v39 = vld [vmem:[#allocation8 + $0x1f4] ss:$8 sps:$4 sm:$0xff]  }
 0x23d   :  { %3846 = vmatpush2.bf16.msra.mxu0 %v5784_v54  ;;  %v5862_v54 = vld [vmem:[#allocation8 + $0x1f0] ss:$8 sps:$4 sm:$0xff]  }
 0x23e   :  { %3887 = vmatpush2.bf16.msra.mxu1 %v5787_v55  ;;  %4301 = vmatprep.subr.bf16.mxu0 %v5792_v57  ;;  %v5825_v55 = vld [vmem:[#allocation8 + $0xc4] ss:$8 sps:$4 sm:$0xff]   ;;  %v5823_v57 = vld [vmem:[#allocation8 + $0xc0] ss:$8 sps:$4 sm:$0xff]  }
 0x23f   :  { %4342 = vmatprep.subr.bf16.mxu1 %v5840_v12 }
 0x240   :  { %v3603_v2 = vpop.f32.mrf.mxu0  ;;  %3848 = vmatmul.mubr.bf16.vlgmr.msra.gmra.mxu0 %v6150_v63 }
 0x241   :  { %v3644_v3 = vpop.f32.mrf.mxu1  ;;  %3889 = vmatmul.mubr.bf16.vlgmr.msra.gmra.mxu1 %v6154_v0  ;;  %v3604_v6 = vadd.f32 %v3603_v2, %v616_v60  ;;  %4302 = vmatpush1.bf16.msra.mxu0 %v5790_v1  ;;  %v5801_v0 = vld [vmem:[#allocation8 + $0x44] ss:$8 sps:$4 sm:$0xff]   ;;  %v5826_v60 = vld [vmem:[#allocation8 + $0xb0] ss:$8 sps:$4 sm:$0xff]   ;;  %v5871_v2 = vld [vmem:[#allocation8 + $0x1c0] ss:$8 sps:$4 sm:$0xff]  }
 0x242   :  { %4333 = vmatprep.mubr.bf16.mxu0 %v3902_v48  ;;  %v3605_v4 = vpop.f32.mrf.mxu0  ;;  %4303 = vmatprep.subr.bf16.mxu0 %v5795_v44  ;;  %v5868_v1 = vld [vmem:[#allocation8 + $0x1d0] ss:$8 sps:$4 sm:$0xff]   ;;  %v5831_v44 = vld [vmem:[#allocation8 + $0xa4] ss:$8 sps:$4 sm:$0xff]  }
 0x243   :  { %v3646_v5 = vpop.f32.mrf.mxu1  ;;  %v6206_v35 = vadd.f32 %v3644_v3, %v3604_v6  ;;  %v3606_v27 = vadd.f32 %v3605_v4, %v620_v22  ;;  %4343 = vmatpush1.bf16.msra.mxu1 %v5838_v11  ;;  %v5873_v48 = vld [vmem:[#allocation8 + $0x1c4] ss:$8 sps:$4 sm:$0xff]   ;;  %v5829_v22 = vld [vmem:[#allocation8 + $0xa0] ss:$8 sps:$4 sm:$0xff]   ;;  %v5834_v3 = vld [vmem:[#allocation8 + $0x94] ss:$8 sps:$4 sm:$0xff]  }
 0x244   :  { %v3607_v9 = vpop.f32.mrf.mxu0  ;;  %4344 = vmatprep.subr.bf16.mxu1 %v5843_v13  ;;  %v5876_v6 = vld [vmem:[#allocation8 + $0x1b4] ss:$8 sps:$4 sm:$0xff]   ;;  %v5874_v4 = vld [vmem:[#allocation8 + $0x1b0] ss:$8 sps:$4 sm:$0xff]  }
 0x245   :  { %v3648_v36 = vpop.f32.mrf.mxu1  ;;  %v6208_v37 = vadd.f32 %v3646_v5, %v3606_v27  ;;  %4304 = vmatpush1.bf16.msra.mxu0 %v5793_v7  ;;  %v5832_v7 = vld [vmem:[#allocation8 + $0x90] ss:$8 sps:$4 sm:$0xff]   ;;  %v5837_v5 = vld [vmem:[#allocation8 + $0x84] ss:$8 sps:$4 sm:$0xff]   ;;  %v3897_v27 = vmax.f32 %v6195_v52, 0.0 }
 0x246   :  { %v3608_v63 = vpop.f32.mrf.mxu0  ;;  %4305 = vmatprep.subr.bf16.mxu0 %v5798_v8  ;;  %v5835_v8 = vld [vmem:[#allocation8 + $0x80] ss:$8 sps:$4 sm:$0xff]   ;;  %v5879_v36 = vld [vmem:[#allocation8 + $0x1a4] ss:$8 sps:$4 sm:$0xff]   ;;  %v5882_v13 = vld [vmem:[#allocation8 + $0x194] ss:$8 sps:$4 sm:$0xff]  }
 0x247   :  { %v3649_v10 = vpop.f32.mrf.mxu1  ;;  %4345 = vmatpush1.bf16.msra.mxu1 %v5841_v15  ;;  %v3901_v9 = vpack.c.bf16 %v3897_v27, %v3897_v27 }
 0x248   :  { %4346 = vmatprep.subr.bf16.mxu1 %v5846_v20 }
 0x249   :  { %4306 = vmatpush1.bf16.msra.mxu0 %v5796_v40  ;;  %v5877_v40 = vld [vmem:[#allocation8 + $0x1a0] ss:$8 sps:$4 sm:$0xff]  }
 0x24a   :  { %4307 = vmatprep.subr.bf16.mxu0 %v5801_v0 }
 0x24b   :  { %4347 = vmatpush1.bf16.msra.mxu1 %v5844_v26 }
 0x24c   :  { %4348 = vmatprep.subr.bf16.mxu1 %v5849_v30  ;;  %v5885_v30 = vld [vmem:[#allocation8 + $0x184] ss:$8 sps:$4 sm:$0xff]  }
 0x24d   :  { %4308 = vmatpush1.bf16.msra.mxu0 %v5799_v14 }
 0x24e   :  { %4309 = vmatprep.subr.bf16.mxu0 %v5804_v19  ;;  %v5880_v19 = vld [vmem:[#allocation8 + $0x190] ss:$8 sps:$4 sm:$0xff]  }
 0x24f   :  { %4349 = vmatpush1.bf16.msra.mxu1 %v5847_v17 }
 0x250   :  { %4350 = vmatprep.subr.bf16.mxu1 %v5852_v32 }
 0x251   :  { %4310 = vmatpush1.bf16.msra.mxu0 %v5802_v21 }
 0x252   :  { %4311 = vmatprep.subr.bf16.mxu0 %v5807_v28 }
 0x253   :  { %4351 = vmatpush1.bf16.msra.mxu1 %v5850_v47 }
 0x254   :  { %4352 = vmatprep.subr.bf16.mxu1 %v5855_v34 }
 0x255   :  { %4312 = vmatpush1.bf16.msra.mxu0 %v5805_v16  ;;  %v5883_v16 = vld [vmem:[#allocation8 + $0x180] ss:$8 sps:$4 sm:$0xff]  }
 0x256   :  { %4313 = vmatprep.subr.bf16.mxu0 %v5810_v31 }
 0x257   :  { %4353 = vmatpush1.bf16.msra.mxu1 %v5853_v24 }
 0x258   :  { %4354 = vmatprep.subr.bf16.mxu1 %v5858_v41 }
 0x259   :  { %4314 = vmatpush1.bf16.msra.mxu0 %v5808_v33 }
 0x25a   :  { %4315 = vmatprep.subr.bf16.mxu0 %v5813_v51 }
 0x25b   :  { %4355 = vmatpush1.bf16.msra.mxu1 %v5856_v43 }
 0x25c   :  { %4356 = vmatprep.subr.bf16.mxu1 %v5861_v45 }
 0x25d   :  { %4316 = vmatpush1.bf16.msra.mxu0 %v5811_v18 }
 0x25e   :  { %4317 = vmatprep.subr.bf16.mxu0 %v5816_v25 }
 0x25f   :  { %4357 = vmatpush1.bf16.msra.mxu1 %v5859_v50 }
 0x260   :  { %4358 = vmatprep.subr.bf16.mxu1 %v5864_v39 }
 0x261   :  { %4318 = vmatpush2.bf16.msra.mxu0 %v5814_v42 }
 0x262   :  { %4319 = vmatprep.subr.bf16.mxu0 %v5819_v23 }
 0x263   :  { %4359 = vmatpush2.bf16.msra.mxu1 %v5862_v54 }
 0x264   :  { %4360 = vmatprep.subr.bf16.mxu1 %v5867_v56 }
 0x265   :  { %4320 = vmatpush2.bf16.msra.mxu0 %v5817_v49 }
 0x266   :  { %4321 = vmatprep.subr.bf16.mxu0 %v5822_v38 }
 0x267   :  { %4361 = vmatpush2.bf16.msra.mxu1 %v5865_v61 }
 0x268   :  { %4362 = vmatprep.subr.bf16.mxu1 %v5870_v58 }
 0x269   :  { %4322 = vmatpush2.bf16.msra.mxu0 %v5820_v29 }
 0x26a   :  { %4323 = vmatprep.subr.bf16.mxu0 %v5825_v55 }
 0x26b   :  { %4363 = vmatpush2.bf16.msra.mxu1 %v5868_v1 }
 0x26c   :  { %4364 = vmatprep.subr.bf16.mxu1 %v5873_v48  ;;  %v3969_v48 = vld [vmem:[#allocation10] sm:$0x3] }
 0x26d   :  { %4324 = vmatpush2.bf16.msra.mxu0 %v5823_v57 }
 0x26e   :  { %4325 = vmatprep.subr.bf16.mxu0 %v5828_v46 }
 0x26f   :  { %4365 = vmatpush2.bf16.msra.mxu1 %v5871_v2  ;;  %v3978_v2 = vrot.slane %v3969_v48, %v611_v62 }
 0x270   :  { %4366 = vmatprep.subr.bf16.mxu1 %v5876_v6 }
 0x271   :  { %4326 = vmatpush2.bf16.msra.mxu0 %v5826_v60 }
 0x272   :  { %4327 = vmatprep.subr.bf16.mxu0 %v5831_v44 }
 0x273   :  { %4367 = vmatpush2.bf16.msra.mxu1 %v5874_v4 }
 0x274   :  { %4368 = vmatprep.subr.bf16.mxu1 %v5879_v36 }
 0x275   :  { %4328 = vmatpush2.bf16.msra.mxu0 %v5829_v22  ;;  %v3974_v22 = vrot.slane %v3969_v48, %v607_v59 }
 0x276   :  { %4329 = vmatprep.subr.bf16.mxu0 %v5834_v3 }
 0x277   :  { %4369 = vmatpush2.bf16.msra.mxu1 %v5877_v40 }
 0x278   :  { %4370 = vmatprep.subr.bf16.mxu1 %v5882_v13 }
 0x279   :  { %4330 = vmatpush2.bf16.msra.mxu0 %v5832_v7 }
 0x27a   :  { %4331 = vmatprep.subr.bf16.mxu0 %v5837_v5 }
 0x27b   :  { %4371 = vmatpush2.bf16.msra.mxu1 %v5880_v19 }
 0x27c   :  { %4372 = vmatprep.subr.bf16.mxu1 %v5885_v30 }
 0x27d   :  { %4332 = vmatpush2.bf16.msra.mxu0 %v5835_v8 }
 0x27f   :  { %4373 = vmatpush2.bf16.msra.mxu1 %v5883_v16 }
 0x280   :  { %v3685_v63 = vpop.f32.mrf.mxu0  ;;  %4334 = vmatmul.mubr.bf16.vlgmr.msra.gmra.mxu0 %v3901_v9 }
 0x281   :  { %v3726_v10 = vpop.f32.mrf.mxu1  ;;  %v3686_v0 = vadd.f32 %v3685_v63, %v6206_v35 }
 0x282   :  { %v3687_v11 = vpop.f32.mrf.mxu0 }
 0x283   :  { %v3728_v12 = vpop.f32.mrf.mxu1  ;;  %v3727_v14 = vadd.f32 %v3726_v10, %v3686_v0  ;;  %v3688_v15 = vadd.f32 %v3687_v11, %v6208_v37 }
 0x284   :  { %v3689_v52 = vpop.f32.mrf.mxu0 }
 0x285   :  { %v3730_v20 = vpop.f32.mrf.mxu1  ;;  %v3729_v21 = vadd.f32 %v3728_v12, %v3688_v15 }
 0x286   :  { %v3690_v26 = vpop.f32.mrf.mxu0 }
 0x287   :  { %v3731_v28 = vpop.f32.mrf.mxu1 }
 0x2c0   :  { %v3767_v35 = vpop.f32.mrf.mxu0 }
 0x2c1   :  { %v3808_v17 = vpop.f32.mrf.mxu1  ;;  %v3768_v31 = vadd.f32 %v3767_v35, %v3727_v14 }
 0x2c2   :  { %v3769_v32 = vpop.f32.mrf.mxu0 }
 0x2c3   :  { %v3810_v33 = vpop.f32.mrf.mxu1  ;;  %v3809_v47 = vadd.f32 %v3808_v17, %v3768_v31  ;;  %v3770_v24 = vadd.f32 %v3769_v32, %v3729_v21 }
 0x2c4   :  { %v3771_v51 = vpop.f32.mrf.mxu0 }
 0x2c5   :  { %v3812_v37 = vpop.f32.mrf.mxu1  ;;  %v3811_v42 = vadd.f32 %v3810_v33, %v3770_v24 }
 0x2c6   :  { %v3772_v34 = vpop.f32.mrf.mxu0 }
 0x2c7   :  { %v3813_v18 = vpop.f32.mrf.mxu1 }
 0x300   :  { %v3849_v25 = vpop.f32.mrf.mxu0 }
 0x301   :  { %v3890_v41 = vpop.f32.mrf.mxu1  ;;  %v3850_v43 = vadd.f32 %v3849_v25, %v3809_v47 }
 0x302   :  { %v3851_v23 = vpop.f32.mrf.mxu0 }
 0x303   :  { %v3892_v45 = vpop.f32.mrf.mxu1  ;;  %v3891_v49 = vadd.f32 %v3890_v41, %v3850_v43  ;;  %v3852_v50 = vadd.f32 %v3851_v23, %v3811_v42 }
 0x304   :  { %v3853_v38 = vpop.f32.mrf.mxu0 }
 0x305   :  { %v3894_v39 = vpop.f32.mrf.mxu1  ;;  %v3893_v29 = vadd.f32 %v3892_v45, %v3852_v50  ;;  %v3899_v54 = vmax.f32 %v3891_v49, 0.0 }
 0x306   :  { %v3854_v55 = vpop.f32.mrf.mxu0 }
 0x307   :  { %v3895_v56 = vpop.f32.mrf.mxu1  ;;  %v3900_v57 = vmax.f32 %v3893_v29, 0.0  ;;  %v3903_v46 = vpack.c.bf16 %v3899_v54, %v3899_v54 }
 0x309   :  { %v3904_v61 = vpack.c.bf16 %v3900_v57, %v3900_v57 }
 0x30b   :  { %4374 = vmatprep.mubr.bf16.mxu1 %v3904_v61 }
 0x30c   :  { %4375 = vmatmul.mubr.bf16.vlgmr.msra.gmra.mxu1 %v3903_v46 }
 0x340   :  { %v4335_v58 = vpop.f32.mrf.mxu0 }
 0x341   :  { %v4336_v3 = vadd.f32 %v4335_v58, %v3974_v22 }
 0x342   :  { %v4337_v60 = vpop.f32.mrf.mxu0 }
 0x343   :  { %v4338_v7 = vadd.f32 %v4337_v60, %v3978_v2 }
 0x344   :  { %v4339_v1 = vpop.f32.mrf.mxu0 }
 0x346   :  { %v4340_v44 = vpop.f32.mrf.mxu0 }
 0x3cc   :  { %v4376_v6 = vpop.f32.mrf.mxu1 }
 0x3cd   :  { %v4377_v4 = vadd.f32 %v4376_v6, %v4336_v3 }
 0x3ce   :  { %v4378_v5 = vpop.f32.mrf.mxu1 }
 0x3cf   :  { %v4383_v8 = vmax.f32 %v4377_v4, 0.0  ;;  %v4379_v27 = vadd.f32 %v4378_v5, %v4338_v7 }
 0x3d0   :  { %v4380_v9 = vpop.f32.mrf.mxu1 }
 0x3d1   :  { %4385 = vst [vmem:[#allocation11] sm:$0xff] %v4383_v8  ;;  %v4384_v36 = vmax.f32 %v4379_v27, 0.0 }
 0x3d2   :  { %v4381_v40 = vpop.f32.mrf.mxu1 }
 0x3d3   :  { %4386 = vst [vmem:[#allocation11 + $0x8] sm:$0xff] %v4384_v36 }
 0x3d4   :  { %5998 = shalt.err (!%p5995_p1)
}
 0x3d5   :  { %4396 = dma.vmem_to_hbm [thread:$0]  %s4394_s4, 256, %s6225_s5, [#allocation4]  }
 0x3d6   :  { %6013 = dma.done.wait [#allocation4], 256  }
 0x3d7   :  { %6014 = vsyncadd [#allocation4], 4294967040 }
 0x3d8   :  { %4400 = vsyncpa [#allocation3], 1 }
 0x3d9   :  { %4401 = vsyncpa [#allocation6], 1 }
 0x3da   :  { %4402 = vsyncpa [#allocation9], 1 }
 0x3db   :  { %4403 = vsyncpa [#allocation4], 1 }

</bundles_post_ra>
